<compile_context>
chip_gen: v6e
topology: v6e:2x2x1
jax: 0.10.0
libtpu: 0.0.40
codegen_flags: <defaults>
</compile_context>

<pallas_src>
import functools
import math

import jax
import jax.numpy as jnp
import numpy as np
from jax import lax
from jax.experimental import pallas as pl
from jax.experimental.pallas import tpu as pltpu

_HAS_BUFFERED = hasattr(pl, "Buffered")
_VMEM_LIMIT_CACHE = None


# ----------------------------- small helpers ---------------------------------

def _round_up(n, m):
    return ((n + m - 1) // m) * m


def _vmem_limit_bytes():
    """Per-chip scoped-VMEM limit: ~3/4 of physical VMEM (48 MiB on v7x,
    96 MiB on v5e/v6e). Falls back to 48 MiB if the query is unavailable."""
    global _VMEM_LIMIT_CACHE
    if _VMEM_LIMIT_CACHE is None:
        try:
            cap = int(pltpu.get_tpu_info().vmem_capacity_bytes)
        except Exception:
            cap = 64 * 1024 * 1024
        _VMEM_LIMIT_CACHE = max(32 * 1024 * 1024, (cap * 3) // 4)
    return _VMEM_LIMIT_CACHE


def _pick_divisor_tile(n, step, cap):
    """Largest multiple of `step` that divides n and is <= cap, preferring a
    tile <= n//2 so the 1-D grid has length >= 2 (v7x megacore)."""
    if step <= 0 or n < step or n % step:
        return None
    for limit in (min(cap, n // 2), min(cap, n)):
        t = (limit // step) * step
        while t >= step:
            if n % t == 0:
                return t
            t -= step
    return None


def _pick_row_tile(n, step, cap):
    """Row tile for row-independent kernels; allows a ragged last tile."""
    if n <= step:
        return n
    t = _pick_divisor_tile(n, step, cap)
    if t is not None:
        return t
    half = ((n // 2 + step - 1) // step) * step
    return max(step, min((max(cap, step) // step) * step, half))


def _const_spec(a, single_buffer):
    """Full-array, grid-invariant BlockSpec; optionally single-buffered so the
    resident weights use half the VMEM (constant index map -> no refetch)."""
    nd = a.ndim
    index_map = lambda *_args, _nd=nd: (0,) * _nd
    if single_buffer and _HAS_BUFFERED:
        return pl.BlockSpec(a.shape, index_map, pipeline_mode=pl.Buffered(1))
    return pl.BlockSpec(a.shape, index_map)


# ----------------------------- kernel math ------------------------------------

def _gelu_exact(x):
    # Matches torch.nn.GELU() default (erf formulation), computed in f32.
    return 0.5 * x * (1.0 + lax.erf(x * (1.0 / math.sqrt(2.0))))


def _masked_layernorm(z, gamma, beta, valid, eps=1e-5):
    """LayerNorm over the first `valid` lanes. Padded lanes of gamma/beta are
    zero, so the padded lanes of the result are exactly zero."""
    width = z.shape[-1]
    inv = 1.0 / valid
    if valid == width:
        mean = jnp.mean(z, axis=-1, keepdims=True)
        d = z - mean
    else:
        mask = lax.broadcasted_iota(jnp.int32, z.shape, z.ndim - 1) < valid
        zm = jnp.where(mask, z, 0.0)
        mean = jnp.sum(zm, axis=-1, keepdims=True) * inv
        d = jnp.where(mask, z - mean, 0.0)
    var = jnp.sum(d * d, axis=-1, keepdims=True) * inv
    return d * lax.rsqrt(var + eps) * gamma + beta


def _linear_ln_gelu(h, w_ref, aux_ref, valid):
    """Linear (bf16 MXU, f32 acc) -> masked LayerNorm -> GELU.
    aux = [bias; gamma; beta] packed as one (3, padded_fo) array."""
    a = aux_ref[...]
    b, g, be = a[0:1, :], a[1:2, :], a[2:3, :]
    z = jnp.dot(h.astype(jnp.bfloat16), w_ref[...],
                preferred_element_type=jnp.float32) + b
    return _gelu_exact(_masked_layernorm(z, g, be, valid))


def _output_head(pooled, w4_ref, a4_ref, w5_ref, a5_ref, h2_valid, d_out):
    """output_projector: Linear->LN->GELU, then Linear->LN (lane-padded)."""
    y = _linear_ln_gelu(pooled, w4_ref, a4_ref, h2_valid)
    a5 = a5_ref[...]
    b5, g5, be5 = a5[0:1, :], a5[1:2, :], a5[2:3, :]
    z = jnp.dot(y.astype(jnp.bfloat16), w5_ref[...],
                preferred_element_type=jnp.float32) + b5
    return _masked_layernorm(z, g5, be5, d_out)


# ----------------------------- kernels -----------------------------------------

def _fused_kernel(x_ref, pool_ref, w1_ref, a1_ref, w2_ref, a2_ref, w3_ref,
                  a3_ref, w4_ref, a4_ref, w5_ref, a5_ref, o_ref, *,
                  seg, h_valid, h2_valid, d_out):
    """Whole forward on one row tile: 3x(Linear+LN+GELU), segment-mean pool via
    a constant 0/1 matrix on the MXU, then the output projector."""
    h = x_ref[...].astype(jnp.float32)                       # (TM, Din)
    h = _linear_ln_gelu(h, w1_ref, a1_ref, h_valid)
    h = _linear_ln_gelu(h, w2_ref, a2_ref, h_valid)
    h = _linear_ln_gelu(h, w3_ref, a3_ref, h_valid)
    pooled = jnp.dot(pool_ref[...], h.astype(jnp.bfloat16),   # (TM//S, HPAD)
                     preferred_element_type=jnp.float32) * (1.0 / seg)
    o_ref[...] = _output_head(pooled, w4_ref, a4_ref, w5_ref, a5_ref,
                              h2_valid, d_out).astype(o_ref.dtype)


def _feat_kernel(x_ref, w1_ref, a1_ref, w2_ref, a2_ref, w3_ref, a3_ref, o_ref,
                 *, h_valid):
    """feature_extractor only (ragged-T fallback); writes bf16 to halve HBM."""
    h = x_ref[...].astype(jnp.float32)
    h = _linear_ln_gelu(h, w1_ref, a1_ref, h_valid)
    h = _linear_ln_gelu(h, w2_ref, a2_ref, h_valid)
    h = _linear_ln_gelu(h, w3_ref, a3_ref, h_valid)
    o_ref[...] = h.astype(o_ref.dtype)


def _head_kernel(p_ref, w4_ref, a4_ref, w5_ref, a5_ref, o_ref, *,
                 h2_valid, d_out):
    """output_projector over flattened pooled rows (ragged-T fallback)."""
    pooled = p_ref[...].astype(jnp.float32)
    o_ref[...] = _output_head(pooled, w4_ref, a4_ref, w5_ref, a5_ref,
                              h2_valid, d_out).astype(o_ref.dtype)


# ----------------------------- parameter prep ----------------------------------

def _pack_aux(b, g, be, pad_to):
    a = jnp.concatenate([b.reshape(1, -1), g.reshape(1, -1),
                         be.reshape(1, -1)], axis=0).astype(jnp.float32)
    if pad_to > a.shape[1]:
        a = jnp.pad(a, ((0, 0), (0, pad_to - a.shape[1])))
    return a


def prepare_params(params):
    """One-time prep (hoisted out of the forward): pad every feature width to a
    multiple of 128 with zeros, cast weights to bf16, pack bias/gamma/beta."""
    (w1, b1, g1, be1, w2, b2, g2, be2, w3, b3, g3, be3,
     w4, b4, g4, be4, w5, b5, g5, be5) = params
    Din, H = w1.shape
    H2 = w4.shape[1]
    Dout = w5.shape[1]
    HP, H2P, DP = (_round_up(d, 128) for d in (H, H2, Dout))

    def padw(w, ri, ro):
        fi, fo = w.shape
        return jnp.pad(w, ((0, ri - fi), (0, ro - fo))).astype(jnp.bfloat16)

    w1p = padw(w1, Din, HP)
    w2p = padw(w2, HP, HP)
    w3p = padw(w3, HP, HP)
    w4p = padw(w4, HP, H2P)
    w5p = padw(w5, H2P, DP)
    a1 = _pack_aux(b1, g1, be1, HP)
    a2 = _pack_aux(b2, g2, be2, HP)
    a3 = _pack_aux(b3, g3, be3, HP)
    a4 = _pack_aux(b4, g4, be4, H2P)
    a5 = _pack_aux(b5, g5, be5, DP)
    weights = (w1p, a1, w2p, a2, w3p, a3, w4p, a4, w5p, a5)
    weight_bytes = sum(int(np.prod(a.shape)) * a.dtype.itemsize for a in weights)
    return dict(dims=(Din, H, H2, Dout, HP, H2P, DP),
                weights=weights, weight_bytes=weight_bytes)


# ----------------------------- forward ------------------------------------------

def _forward(x, pp, target_length, *, single_buffer_weights):
    B, T, _ = x.shape
    L = int(target_length)
    Din, H, H2, Dout, HP, H2P, DP = pp["dims"]
    (w1p, a1, w2p, a2, w3p, a3, w4p, a4, w5p, a5) = pp["weights"]
    N, M = B * T, B * L
    x_flat = x.reshape(N, Din).astype(jnp.float32)

    sb = bool(single_buffer_weights) and _HAS_BUFFERED
    vmem = _vmem_limit_bytes()
    cp = pltpu.CompilerParams(dimension_semantics=("parallel",),
                              vmem_limit_bytes=int(vmem))
    wbytes = pp["weight_bytes"] * (1 if sb else 2)
    budget = max(2 << 20, vmem - wbytes - (4 << 20))
    const = lambda a: _const_spec(a, sb)

    # ---- fused path: feature extractor + pool + output head in one call ----
    if T % L == 0:
        S = T // L
        per_row = Din * 8 + (DP * 8) // S + HP * 16
        cap = max(8 * S, min(budget // per_row, 1024))
        TM = _pick_divisor_tile(N, 8 * S, cap)
        if TM is None and N <= cap:
            TM = N                               # single full-dim block
        if TM is not None:
            Mt = TM // S
            # Constant 0/1 segment matrix (exact in bf16); 1/S applied in f32.
            pool01 = jnp.asarray(
                np.kron(np.eye(Mt, dtype=np.float32),
                        np.ones((1, S), dtype=np.float32)), jnp.bfloat16)
            out_pad = pl.pallas_call(
                functools.partial(_fused_kernel, seg=S, h_valid=H,
                                  h2_valid=H2, d_out=Dout),
                out_shape=jax.ShapeDtypeStruct((M, DP), jnp.float32),
                grid=(N // TM,),
                in_specs=[pl.BlockSpec((TM, Din), lambda i: (i, 0)),
                          const(pool01),
                          const(w1p), const(a1), const(w2p), const(a2),
                          const(w3p), const(a3), const(w4p), const(a4),
                          const(w5p), const(a5)],
                out_specs=pl.BlockSpec((Mt, DP), lambda i: (i, 0)),
                compiler_params=cp,
            )(x_flat, pool01, w1p, a1, w2p, a2, w3p, a3, w4p, a4, w5p, a5)
            return out_pad[:, :Dout].reshape(B, L, Dout)

    # ---- two-stage path (ragged T, or no exact fused tiling) ----
    # Stage 1: feature extractor over flattened rows, bf16 intermediate.
    per_row1 = Din * 8 + HP * 4 + HP * 16
    cap1 = max(16, min(budget // per_row1, 2048))
    TM = _pick_row_tile(N, 16, cap1)
    h = pl.pallas_call(
        functools.partial(_feat_kernel, h_valid=H),
        out_shape=jax.ShapeDtypeStruct((N, HP), jnp.bfloat16),
        grid=(pl.cdiv(N, TM),),
        in_specs=[pl.BlockSpec((TM, Din), lambda i: (i, 0)),
                  const(w1p), const(a1), const(w2p), const(a2),
                  const(w3p), const(a3)],
        out_specs=pl.BlockSpec((TM, HP), lambda i: (i, 0)),
        compiler_params=cp,
    )(x_flat, w1p, a1, w2p, a2, w3p, a3)

    # Adaptive average pool (plain XLA; single batched contraction).
    if T % L == 0:
        S = T // L
        pooled = jnp.mean(h.reshape(B, L, S, HP).astype(jnp.float32), axis=2)
    else:
        P = adaptive_avg_pool1d_matrix(T, L)
        pooled = jnp.einsum("lt,bth->blh", P,
                            h.reshape(B, T, HP).astype(jnp.float32))
    pooled = pooled.reshape(M, HP)

    # Stage 2: output projector over flattened pooled rows.
    per_row2 = HP * 8 + DP * 8 + max(HP, H2P) * 16
    cap2 = max(8, min(budget // per_row2, 2048))
    TL = _pick_row_tile(M, 8, cap2)
    out_pad = pl.pallas_call(
        functools.partial(_head_kernel, h2_valid=H2, d_out=Dout),
        out_shape=jax.ShapeDtypeStruct((M, DP), jnp.float32),
        grid=(pl.cdiv(M, TL),),
        in_specs=[pl.BlockSpec((TL, HP), lambda i: (i, 0)),
                  const(w4p), const(a4), const(w5p), const(a5)],
        out_specs=pl.BlockSpec((TL, DP), lambda i: (i, 0)),
        compiler_params=cp,
    )(pooled, w4p, a4, w5p, a5)
    return out_pad[:, :Dout].reshape(B, L, Dout)


def modality_projector(x, params, target_length):
    """x: (B, T, Din) f32.  params: prepare_params(...) dict (preferred) or the
    flat 20-array list.  Returns (B, target_length, Dout)."""
    pp = params if isinstance(params, dict) else prepare_params(params)
    attempts = (True, False) if _HAS_BUFFERED else (False,)
    last_err = None
    for sb in attempts:
        try:
            return _forward(x, pp, target_length, single_buffer_weights=sb)
        except Exception as e:   # e.g. Buffered(1) unsupported -> double-buffer
            last_err = e
    raise last_err


# ----------------------------- parameter init -----------------------------------

def _xavier_uniform(key, fan_in, fan_out, dtype=jnp.float32):
    bound = math.sqrt(6.0 / (fan_in + fan_out))
    # Stored as (in, out); the bound is symmetric in fan_in/fan_out so this
    # matches torch.nn.init.xavier_uniform_ on the (out, in) torch weight.
    return jax.random.uniform(key, (fan_in, fan_out), dtype, -bound, bound)


def init_params(key, input_dim, output_dim):
    hidden = input_dim * 2
    half = hidden // 2
    dims = [(input_dim, hidden), (hidden, hidden), (hidden, hidden),
            (hidden, half), (half, output_dim)]
    keys = jax.random.split(key, len(dims))
    params = []
    for k, (fi, fo) in zip(keys, dims):
        w = _xavier_uniform(k, fi, fo)
        b = jnp.zeros((1, fo), jnp.float32)      # Linear bias (zeros init)
        g = jnp.ones((1, fo), jnp.float32)       # LayerNorm weight
        be = jnp.zeros((1, fo), jnp.float32)     # LayerNorm bias
        params += [w, b, g, be]
    return params


def adaptive_avg_pool1d_matrix(T, L):
    """P[i, t] replicating torch.nn.AdaptiveAvgPool1d(L) over a length-T axis."""
    P = np.zeros((L, T), dtype=np.float32)
    for i in range(L):
        start = (i * T) // L
        end = ((i + 1) * T + L - 1) // L
        P[i, start:end] = 1.0 / (end - start)
    return jnp.asarray(P)


# ----------------------------- pure-JAX reference --------------------------------

def _ref_dot(a, w):
    # Mirrors the kernel's MXU dtype policy: bf16 inputs, f32 accumulation.
    return jnp.dot(a.astype(jnp.bfloat16), w.astype(jnp.bfloat16),
                   preferred_element_type=jnp.float32)


def reference_forward(x, params, target_length):
    (w1, b1, g1, be1, w2, b2, g2, be2, w3, b3, g3, be3,
     w4, b4, g4, be4, w5, b5, g5, be5) = params
    _, T, _ = x.shape

    def ln(z, g, b):
        return _masked_layernorm(z, g, b, z.shape[-1])

    h = _gelu_exact(ln(_ref_dot(x, w1) + b1, g1, be1))
    h = _gelu_exact(ln(_ref_dot(h, w2) + b2, g2, be2))
    h = _gelu_exact(ln(_ref_dot(h, w3) + b3, g3, be3))
    P = adaptive_avg_pool1d_matrix(T, target_length)
    pooled = jnp.einsum("lt,bth->blh", P, h)
    y = _gelu_exact(ln(_ref_dot(pooled, w4) + b4, g4, be4))
    y = ln(_ref_dot(y, w5) + b5, g5, be5)
    return y


# ----------------------------- main ------------------------------------------------

if __name__ == "__main__":
    B = 2
    audio_hidden_dim = 32        # input_dim
    lm_hidden_dim = 64           # output_dim

    k_x, k_p, k_x2 = jax.random.split(jax.random.PRNGKey(0), 3)
    params = init_params(k_p, audio_hidden_dim, lm_hidden_dim)
    prepped = prepare_params(params)   # one-time weight prep (hoisted out of forward)

    # Case 1: T divisible by target_length -> fully fused single-kernel path.
    T, mp_target_length = 16, 8
    x = jax.random.normal(k_x, (B, T, audio_hidden_dim), jnp.float32)
    out = jax.block_until_ready(modality_projector(x, prepped, mp_target_length))
    ref = reference_forward(x, params, mp_target_length)
    assert out.shape == (B, mp_target_length, lm_hidden_dim)
    # bf16 matmul inputs + bf16 pooled intermediate -> allow ~3e-2 mixed-precision slack.
    np.testing.assert_allclose(np.asarray(out), np.asarray(ref),
                               rtol=3e-2, atol=3e-2)

    # Case 2: ragged T -> two-stage path (bf16 intermediate + XLA pool matrix).
    T2, L2 = 12, 5
    x2 = jax.random.normal(k_x2, (B, T2, audio_hidden_dim), jnp.float32)
    out2 = jax.block_until_ready(modality_projector(x2, prepped, L2))
    ref2 = reference_forward(x2, params, L2)
    assert out2.shape == (B, L2, lm_hidden_dim)
    np.testing.assert_allclose(np.asarray(out2), np.asarray(ref2),
                               rtol=3e-2, atol=3e-2)

    print("KERNEL_OK")
</pallas_src>

<mosaic_0001>
module attributes {stable_mosaic.version = 11 : i64} {
  func.func @_fused_kernel(%arg0: i32, %arg1: memref<16x32xf32, #tpu.memory_space<vmem>>, %arg2: memref<8x16xbf16, #tpu.memory_space<vmem>>, %arg3: memref<32x128xbf16, #tpu.memory_space<vmem>>, %arg4: memref<3x128xf32, #tpu.memory_space<vmem>>, %arg5: memref<128x128xbf16, #tpu.memory_space<vmem>>, %arg6: memref<3x128xf32, #tpu.memory_space<vmem>>, %arg7: memref<128x128xbf16, #tpu.memory_space<vmem>>, %arg8: memref<3x128xf32, #tpu.memory_space<vmem>>, %arg9: memref<128x128xbf16, #tpu.memory_space<vmem>>, %arg10: memref<3x128xf32, #tpu.memory_space<vmem>>, %arg11: memref<128x128xbf16, #tpu.memory_space<vmem>>, %arg12: memref<3x128xf32, #tpu.memory_space<vmem>>, %arg13: memref<8x128xf32, #tpu.memory_space<vmem>>) attributes {dimension_semantics = [#tpu.dimension_semantics<parallel>], iteration_bounds = array<i64: 2>, scalar_prefetch = 0 : i64, scratch_operands = 0 : i64, tpu.core_type = #tpu.core_type<tc>, window_params = [{transform_indices = @transform_0, window_bounds = array<i64: 16, 32>}, {pipeline_mode = #tpu.pipeline_mode<synchronous>, transform_indices = @transform_1, window_bounds = array<i64: 8, 16>}, {pipeline_mode = #tpu.pipeline_mode<synchronous>, transform_indices = @transform_2, window_bounds = array<i64: 32, 128>}, {pipeline_mode = #tpu.pipeline_mode<synchronous>, transform_indices = @transform_3, window_bounds = array<i64: 3, 128>}, {pipeline_mode = #tpu.pipeline_mode<synchronous>, transform_indices = @transform_4, window_bounds = array<i64: 128, 128>}, {pipeline_mode = #tpu.pipeline_mode<synchronous>, transform_indices = @transform_5, window_bounds = array<i64: 3, 128>}, {pipeline_mode = #tpu.pipeline_mode<synchronous>, transform_indices = @transform_6, window_bounds = array<i64: 128, 128>}, {pipeline_mode = #tpu.pipeline_mode<synchronous>, transform_indices = @transform_7, window_bounds = array<i64: 3, 128>}, {pipeline_mode = #tpu.pipeline_mode<synchronous>, transform_indices = @transform_8, window_bounds = array<i64: 128, 128>}, {pipeline_mode = #tpu.pipeline_mode<synchronous>, transform_indices = @transform_9, window_bounds = array<i64: 3, 128>}, {pipeline_mode = #tpu.pipeline_mode<synchronous>, transform_indices = @transform_10, window_bounds = array<i64: 128, 128>}, {pipeline_mode = #tpu.pipeline_mode<synchronous>, transform_indices = @transform_11, window_bounds = array<i64: 3, 128>}, {transform_indices = @transform_12, window_bounds = array<i64: 8, 128>}]} {
    %c0 = arith.constant 0 : index
    %c0_0 = arith.constant 0 : index
    %0 = vector.load %arg1[%c0, %c0_0] : memref<16x32xf32, #tpu.memory_space<vmem>>, vector<16x32xf32>
    %c0_1 = arith.constant 0 : index
    %c0_2 = arith.constant 0 : index
    %1 = vector.load %arg4[%c0_1, %c0_2] : memref<3x128xf32, #tpu.memory_space<vmem>>, vector<3x128xf32>
    %2 = vector.extract_strided_slice %1 {offsets = [0, 0], sizes = [1, 128], strides = [1, 1]} : vector<3x128xf32> to vector<1x128xf32>
    %3 = vector.extract_strided_slice %1 {offsets = [1, 0], sizes = [1, 128], strides = [1, 1]} : vector<3x128xf32> to vector<1x128xf32>
    %4 = vector.extract_strided_slice %1 {offsets = [2, 0], sizes = [1, 128], strides = [1, 1]} : vector<3x128xf32> to vector<1x128xf32>
    %5 = arith.truncf %0 : vector<16x32xf32> to vector<16x32xbf16>
    %c0_3 = arith.constant 0 : index
    %c0_4 = arith.constant 0 : index
    %6 = vector.load %arg3[%c0_3, %c0_4] : memref<32x128xbf16, #tpu.memory_space<vmem>>, vector<32x128xbf16>
    %cst = arith.constant dense<0.000000e+00> : vector<16x128xf32>
    %7 = tpu.matmul %5, %6, %cst {dimension_numbers = #tpu.dot_dimension_numbers<[1], [0], [0], [1], [0, 0, 1, 1], [], []>} : vector<16x32xbf16>, vector<32x128xbf16>, vector<16x128xf32> -> vector<16x128xf32>
    %8 = vector.broadcast %2 : vector<1x128xf32> to vector<16x128xf32>
    %9 = arith.addf %7, %8 : vector<16x128xf32>
    %10 = tpu.iota {dimensions = array<i32: 1>} : vector<16x128xi32>
    %c64_i32 = arith.constant 64 : i32
    %11 = vector.broadcast %c64_i32 : i32 to vector<16x128xi32>
    %12 = arith.cmpi slt, %10, %11 : vector<16x128xi32>
    %cst_5 = arith.constant 0.000000e+00 : f32
    %13 = vector.broadcast %cst_5 : f32 to vector<16x128xf32>
    %14 = arith.select %12, %9, %13 : vector<16x128xi1>, vector<16x128xf32>
    %cst_6 = arith.constant dense<0.000000e+00> : vector<16xf32>
    %15 = vector.multi_reduction <add>, %14, %cst_6 [1] : vector<16x128xf32> to vector<16xf32>
    %16 = vector.shape_cast %15 : vector<16xf32> to vector<16x1xf32>
    %cst_7 = arith.constant 1.562500e-02 : f32
    %17 = vector.broadcast %cst_7 : f32 to vector<16x1xf32>
    %18 = arith.mulf %16, %17 : vector<16x1xf32>
    %19 = vector.broadcast %18 : vector<16x1xf32> to vector<16x128xf32>
    %20 = arith.subf %9, %19 : vector<16x128xf32>
    %cst_8 = arith.constant 0.000000e+00 : f32
    %21 = vector.broadcast %cst_8 : f32 to vector<16x128xf32>
    %22 = arith.select %12, %20, %21 : vector<16x128xi1>, vector<16x128xf32>
    %23 = arith.mulf %22, %22 : vector<16x128xf32>
    %cst_9 = arith.constant dense<0.000000e+00> : vector<16xf32>
    %24 = vector.multi_reduction <add>, %23, %cst_9 [1] : vector<16x128xf32> to vector<16xf32>
    %25 = vector.shape_cast %24 : vector<16xf32> to vector<16x1xf32>
    %cst_10 = arith.constant 1.562500e-02 : f32
    %26 = vector.broadcast %cst_10 : f32 to vector<16x1xf32>
    %27 = arith.mulf %25, %26 : vector<16x1xf32>
    %cst_11 = arith.constant 9.99999974E-6 : f32
    %28 = vector.broadcast %cst_11 : f32 to vector<16x1xf32>
    %29 = arith.addf %27, %28 : vector<16x1xf32>
    %30 = math.rsqrt %29 : vector<16x1xf32>
    %31 = vector.broadcast %30 : vector<16x1xf32> to vector<16x128xf32>
    %32 = arith.mulf %22, %31 : vector<16x128xf32>
    %33 = vector.broadcast %3 : vector<1x128xf32> to vector<16x128xf32>
    %34 = arith.mulf %32, %33 : vector<16x128xf32>
    %35 = vector.broadcast %4 : vector<1x128xf32> to vector<16x128xf32>
    %36 = arith.addf %34, %35 : vector<16x128xf32>
    %cst_12 = arith.constant 5.000000e-01 : f32
    %37 = vector.broadcast %cst_12 : f32 to vector<16x128xf32>
    %38 = arith.mulf %37, %36 : vector<16x128xf32>
    %cst_13 = arith.constant 0.707106769 : f32
    %39 = vector.broadcast %cst_13 : f32 to vector<16x128xf32>
    %40 = arith.mulf %36, %39 : vector<16x128xf32>
    %41 = math.erf %40 : vector<16x128xf32>
    %cst_14 = arith.constant 1.000000e+00 : f32
    %42 = vector.broadcast %cst_14 : f32 to vector<16x128xf32>
    %43 = arith.addf %42, %41 : vector<16x128xf32>
    %44 = arith.mulf %38, %43 : vector<16x128xf32>
    %c0_15 = arith.constant 0 : index
    %c0_16 = arith.constant 0 : index
    %45 = vector.load %arg6[%c0_15, %c0_16] : memref<3x128xf32, #tpu.memory_space<vmem>>, vector<3x128xf32>
    %46 = vector.extract_strided_slice %45 {offsets = [0, 0], sizes = [1, 128], strides = [1, 1]} : vector<3x128xf32> to vector<1x128xf32>
    %47 = vector.extract_strided_slice %45 {offsets = [1, 0], sizes = [1, 128], strides = [1, 1]} : vector<3x128xf32> to vector<1x128xf32>
    %48 = vector.extract_strided_slice %45 {offsets = [2, 0], sizes = [1, 128], strides = [1, 1]} : vector<3x128xf32> to vector<1x128xf32>
    %49 = arith.truncf %44 : vector<16x128xf32> to vector<16x128xbf16>
    %c0_17 = arith.constant 0 : index
    %c0_18 = arith.constant 0 : index
    %50 = vector.load %arg5[%c0_17, %c0_18] : memref<128x128xbf16, #tpu.memory_space<vmem>>, vector<128x128xbf16>
    %cst_19 = arith.constant dense<0.000000e+00> : vector<16x128xf32>
    %51 = tpu.matmul %49, %50, %cst_19 {dimension_numbers = #tpu.dot_dimension_numbers<[1], [0], [0], [1], [0, 0, 1, 1], [], []>} : vector<16x128xbf16>, vector<128x128xbf16>, vector<16x128xf32> -> vector<16x128xf32>
    %52 = vector.broadcast %46 : vector<1x128xf32> to vector<16x128xf32>
    %53 = arith.addf %51, %52 : vector<16x128xf32>
    %54 = tpu.iota {dimensions = array<i32: 1>} : vector<16x128xi32>
    %c64_i32_20 = arith.constant 64 : i32
    %55 = vector.broadcast %c64_i32_20 : i32 to vector<16x128xi32>
    %56 = arith.cmpi slt, %54, %55 : vector<16x128xi32>
    %cst_21 = arith.constant 0.000000e+00 : f32
    %57 = vector.broadcast %cst_21 : f32 to vector<16x128xf32>
    %58 = arith.select %56, %53, %57 : vector<16x128xi1>, vector<16x128xf32>
    %cst_22 = arith.constant dense<0.000000e+00> : vector<16xf32>
    %59 = vector.multi_reduction <add>, %58, %cst_22 [1] : vector<16x128xf32> to vector<16xf32>
    %60 = vector.shape_cast %59 : vector<16xf32> to vector<16x1xf32>
    %cst_23 = arith.constant 1.562500e-02 : f32
    %61 = vector.broadcast %cst_23 : f32 to vector<16x1xf32>
    %62 = arith.mulf %60, %61 : vector<16x1xf32>
    %63 = vector.broadcast %62 : vector<16x1xf32> to vector<16x128xf32>
    %64 = arith.subf %53, %63 : vector<16x128xf32>
    %cst_24 = arith.constant 0.000000e+00 : f32
    %65 = vector.broadcast %cst_24 : f32 to vector<16x128xf32>
    %66 = arith.select %56, %64, %65 : vector<16x128xi1>, vector<16x128xf32>
    %67 = arith.mulf %66, %66 : vector<16x128xf32>
    %cst_25 = arith.constant dense<0.000000e+00> : vector<16xf32>
    %68 = vector.multi_reduction <add>, %67, %cst_25 [1] : vector<16x128xf32> to vector<16xf32>
    %69 = vector.shape_cast %68 : vector<16xf32> to vector<16x1xf32>
    %cst_26 = arith.constant 1.562500e-02 : f32
    %70 = vector.broadcast %cst_26 : f32 to vector<16x1xf32>
    %71 = arith.mulf %69, %70 : vector<16x1xf32>
    %cst_27 = arith.constant 9.99999974E-6 : f32
    %72 = vector.broadcast %cst_27 : f32 to vector<16x1xf32>
    %73 = arith.addf %71, %72 : vector<16x1xf32>
    %74 = math.rsqrt %73 : vector<16x1xf32>
    %75 = vector.broadcast %74 : vector<16x1xf32> to vector<16x128xf32>
    %76 = arith.mulf %66, %75 : vector<16x128xf32>
    %77 = vector.broadcast %47 : vector<1x128xf32> to vector<16x128xf32>
    %78 = arith.mulf %76, %77 : vector<16x128xf32>
    %79 = vector.broadcast %48 : vector<1x128xf32> to vector<16x128xf32>
    %80 = arith.addf %78, %79 : vector<16x128xf32>
    %cst_28 = arith.constant 5.000000e-01 : f32
    %81 = vector.broadcast %cst_28 : f32 to vector<16x128xf32>
    %82 = arith.mulf %81, %80 : vector<16x128xf32>
    %cst_29 = arith.constant 0.707106769 : f32
    %83 = vector.broadcast %cst_29 : f32 to vector<16x128xf32>
    %84 = arith.mulf %80, %83 : vector<16x128xf32>
    %85 = math.erf %84 : vector<16x128xf32>
    %cst_30 = arith.constant 1.000000e+00 : f32
    %86 = vector.broadcast %cst_30 : f32 to vector<16x128xf32>
    %87 = arith.addf %86, %85 : vector<16x128xf32>
    %88 = arith.mulf %82, %87 : vector<16x128xf32>
    %c0_31 = arith.constant 0 : index
    %c0_32 = arith.constant 0 : index
    %89 = vector.load %arg8[%c0_31, %c0_32] : memref<3x128xf32, #tpu.memory_space<vmem>>, vector<3x128xf32>
    %90 = vector.extract_strided_slice %89 {offsets = [0, 0], sizes = [1, 128], strides = [1, 1]} : vector<3x128xf32> to vector<1x128xf32>
    %91 = vector.extract_strided_slice %89 {offsets = [1, 0], sizes = [1, 128], strides = [1, 1]} : vector<3x128xf32> to vector<1x128xf32>
    %92 = vector.extract_strided_slice %89 {offsets = [2, 0], sizes = [1, 128], strides = [1, 1]} : vector<3x128xf32> to vector<1x128xf32>
    %93 = arith.truncf %88 : vector<16x128xf32> to vector<16x128xbf16>
    %c0_33 = arith.constant 0 : index
    %c0_34 = arith.constant 0 : index
    %94 = vector.load %arg7[%c0_33, %c0_34] : memref<128x128xbf16, #tpu.memory_space<vmem>>, vector<128x128xbf16>
    %cst_35 = arith.constant dense<0.000000e+00> : vector<16x128xf32>
    %95 = tpu.matmul %93, %94, %cst_35 {dimension_numbers = #tpu.dot_dimension_numbers<[1], [0], [0], [1], [0, 0, 1, 1], [], []>} : vector<16x128xbf16>, vector<128x128xbf16>, vector<16x128xf32> -> vector<16x128xf32>
    %96 = vector.broadcast %90 : vector<1x128xf32> to vector<16x128xf32>
    %97 = arith.addf %95, %96 : vector<16x128xf32>
    %98 = tpu.iota {dimensions = array<i32: 1>} : vector<16x128xi32>
    %c64_i32_36 = arith.constant 64 : i32
    %99 = vector.broadcast %c64_i32_36 : i32 to vector<16x128xi32>
    %100 = arith.cmpi slt, %98, %99 : vector<16x128xi32>
    %cst_37 = arith.constant 0.000000e+00 : f32
    %101 = vector.broadcast %cst_37 : f32 to vector<16x128xf32>
    %102 = arith.select %100, %97, %101 : vector<16x128xi1>, vector<16x128xf32>
    %cst_38 = arith.constant dense<0.000000e+00> : vector<16xf32>
    %103 = vector.multi_reduction <add>, %102, %cst_38 [1] : vector<16x128xf32> to vector<16xf32>
    %104 = vector.shape_cast %103 : vector<16xf32> to vector<16x1xf32>
    %cst_39 = arith.constant 1.562500e-02 : f32
    %105 = vector.broadcast %cst_39 : f32 to vector<16x1xf32>
    %106 = arith.mulf %104, %105 : vector<16x1xf32>
    %107 = vector.broadcast %106 : vector<16x1xf32> to vector<16x128xf32>
    %108 = arith.subf %97, %107 : vector<16x128xf32>
    %cst_40 = arith.constant 0.000000e+00 : f32
    %109 = vector.broadcast %cst_40 : f32 to vector<16x128xf32>
    %110 = arith.select %100, %108, %109 : vector<16x128xi1>, vector<16x128xf32>
    %111 = arith.mulf %110, %110 : vector<16x128xf32>
    %cst_41 = arith.constant dense<0.000000e+00> : vector<16xf32>
    %112 = vector.multi_reduction <add>, %111, %cst_41 [1] : vector<16x128xf32> to vector<16xf32>
    %113 = vector.shape_cast %112 : vector<16xf32> to vector<16x1xf32>
    %cst_42 = arith.constant 1.562500e-02 : f32
    %114 = vector.broadcast %cst_42 : f32 to vector<16x1xf32>
    %115 = arith.mulf %113, %114 : vector<16x1xf32>
    %cst_43 = arith.constant 9.99999974E-6 : f32
    %116 = vector.broadcast %cst_43 : f32 to vector<16x1xf32>
    %117 = arith.addf %115, %116 : vector<16x1xf32>
    %118 = math.rsqrt %117 : vector<16x1xf32>
    %119 = vector.broadcast %118 : vector<16x1xf32> to vector<16x128xf32>
    %120 = arith.mulf %110, %119 : vector<16x128xf32>
    %121 = vector.broadcast %91 : vector<1x128xf32> to vector<16x128xf32>
    %122 = arith.mulf %120, %121 : vector<16x128xf32>
    %123 = vector.broadcast %92 : vector<1x128xf32> to vector<16x128xf32>
    %124 = arith.addf %122, %123 : vector<16x128xf32>
    %cst_44 = arith.constant 5.000000e-01 : f32
    %125 = vector.broadcast %cst_44 : f32 to vector<16x128xf32>
    %126 = arith.mulf %125, %124 : vector<16x128xf32>
    %cst_45 = arith.constant 0.707106769 : f32
    %127 = vector.broadcast %cst_45 : f32 to vector<16x128xf32>
    %128 = arith.mulf %124, %127 : vector<16x128xf32>
    %129 = math.erf %128 : vector<16x128xf32>
    %cst_46 = arith.constant 1.000000e+00 : f32
    %130 = vector.broadcast %cst_46 : f32 to vector<16x128xf32>
    %131 = arith.addf %130, %129 : vector<16x128xf32>
    %132 = arith.mulf %126, %131 : vector<16x128xf32>
    %c0_47 = arith.constant 0 : index
    %c0_48 = arith.constant 0 : index
    %133 = vector.load %arg2[%c0_47, %c0_48] : memref<8x16xbf16, #tpu.memory_space<vmem>>, vector<8x16xbf16>
    %134 = arith.truncf %132 : vector<16x128xf32> to vector<16x128xbf16>
    %cst_49 = arith.constant dense<0.000000e+00> : vector<8x128xf32>
    %135 = tpu.matmul %133, %134, %cst_49 {dimension_numbers = #tpu.dot_dimension_numbers<[1], [0], [0], [1], [0, 0, 1, 1], [], []>} : vector<8x16xbf16>, vector<16x128xbf16>, vector<8x128xf32> -> vector<8x128xf32>
    %cst_50 = arith.constant 5.000000e-01 : f32
    %136 = vector.broadcast %cst_50 : f32 to vector<8x128xf32>
    %137 = arith.mulf %135, %136 : vector<8x128xf32>
    %c0_51 = arith.constant 0 : index
    %c0_52 = arith.constant 0 : index
    %138 = vector.load %arg10[%c0_51, %c0_52] : memref<3x128xf32, #tpu.memory_space<vmem>>, vector<3x128xf32>
    %139 = vector.extract_strided_slice %138 {offsets = [0, 0], sizes = [1, 128], strides = [1, 1]} : vector<3x128xf32> to vector<1x128xf32>
    %140 = vector.extract_strided_slice %138 {offsets = [1, 0], sizes = [1, 128], strides = [1, 1]} : vector<3x128xf32> to vector<1x128xf32>
    %141 = vector.extract_strided_slice %138 {offsets = [2, 0], sizes = [1, 128], strides = [1, 1]} : vector<3x128xf32> to vector<1x128xf32>
    %142 = arith.truncf %137 : vector<8x128xf32> to vector<8x128xbf16>
    %c0_53 = arith.constant 0 : index
    %c0_54 = arith.constant 0 : index
    %143 = vector.load %arg9[%c0_53, %c0_54] : memref<128x128xbf16, #tpu.memory_space<vmem>>, vector<128x128xbf16>
    %cst_55 = arith.constant dense<0.000000e+00> : vector<8x128xf32>
    %144 = tpu.matmul %142, %143, %cst_55 {dimension_numbers = #tpu.dot_dimension_numbers<[1], [0], [0], [1], [0, 0, 1, 1], [], []>} : vector<8x128xbf16>, vector<128x128xbf16>, vector<8x128xf32> -> vector<8x128xf32>
    %145 = vector.broadcast %139 : vector<1x128xf32> to vector<8x128xf32>
    %146 = arith.addf %144, %145 : vector<8x128xf32>
    %147 = tpu.iota {dimensions = array<i32: 1>} : vector<8x128xi32>
    %c32_i32 = arith.constant 32 : i32
    %148 = vector.broadcast %c32_i32 : i32 to vector<8x128xi32>
    %149 = arith.cmpi slt, %147, %148 : vector<8x128xi32>
    %cst_56 = arith.constant 0.000000e+00 : f32
    %150 = vector.broadcast %cst_56 : f32 to vector<8x128xf32>
    %151 = arith.select %149, %146, %150 : vector<8x128xi1>, vector<8x128xf32>
    %cst_57 = arith.constant dense<0.000000e+00> : vector<8xf32>
    %152 = vector.multi_reduction <add>, %151, %cst_57 [1] : vector<8x128xf32> to vector<8xf32>
    %153 = vector.shape_cast %152 : vector<8xf32> to vector<8x1xf32>
    %cst_58 = arith.constant 3.125000e-02 : f32
    %154 = vector.broadcast %cst_58 : f32 to vector<8x1xf32>
    %155 = arith.mulf %153, %154 : vector<8x1xf32>
    %156 = vector.broadcast %155 : vector<8x1xf32> to vector<8x128xf32>
    %157 = arith.subf %146, %156 : vector<8x128xf32>
    %cst_59 = arith.constant 0.000000e+00 : f32
    %158 = vector.broadcast %cst_59 : f32 to vector<8x128xf32>
    %159 = arith.select %149, %157, %158 : vector<8x128xi1>, vector<8x128xf32>
    %160 = arith.mulf %159, %159 : vector<8x128xf32>
    %cst_60 = arith.constant dense<0.000000e+00> : vector<8xf32>
    %161 = vector.multi_reduction <add>, %160, %cst_60 [1] : vector<8x128xf32> to vector<8xf32>
    %162 = vector.shape_cast %161 : vector<8xf32> to vector<8x1xf32>
    %cst_61 = arith.constant 3.125000e-02 : f32
    %163 = vector.broadcast %cst_61 : f32 to vector<8x1xf32>
    %164 = arith.mulf %162, %163 : vector<8x1xf32>
    %cst_62 = arith.constant 9.99999974E-6 : f32
    %165 = vector.broadcast %cst_62 : f32 to vector<8x1xf32>
    %166 = arith.addf %164, %165 : vector<8x1xf32>
    %167 = math.rsqrt %166 : vector<8x1xf32>
    %168 = vector.broadcast %167 : vector<8x1xf32> to vector<8x128xf32>
    %169 = arith.mulf %159, %168 : vector<8x128xf32>
    %170 = vector.broadcast %140 : vector<1x128xf32> to vector<8x128xf32>
    %171 = arith.mulf %169, %170 : vector<8x128xf32>
    %172 = vector.broadcast %141 : vector<1x128xf32> to vector<8x128xf32>
    %173 = arith.addf %171, %172 : vector<8x128xf32>
    %cst_63 = arith.constant 5.000000e-01 : f32
    %174 = vector.broadcast %cst_63 : f32 to vector<8x128xf32>
    %175 = arith.mulf %174, %173 : vector<8x128xf32>
    %cst_64 = arith.constant 0.707106769 : f32
    %176 = vector.broadcast %cst_64 : f32 to vector<8x128xf32>
    %177 = arith.mulf %173, %176 : vector<8x128xf32>
    %178 = math.erf %177 : vector<8x128xf32>
    %cst_65 = arith.constant 1.000000e+00 : f32
    %179 = vector.broadcast %cst_65 : f32 to vector<8x128xf32>
    %180 = arith.addf %179, %178 : vector<8x128xf32>
    %181 = arith.mulf %175, %180 : vector<8x128xf32>
    %c0_66 = arith.constant 0 : index
    %c0_67 = arith.constant 0 : index
    %182 = vector.load %arg12[%c0_66, %c0_67] : memref<3x128xf32, #tpu.memory_space<vmem>>, vector<3x128xf32>
    %183 = vector.extract_strided_slice %182 {offsets = [0, 0], sizes = [1, 128], strides = [1, 1]} : vector<3x128xf32> to vector<1x128xf32>
    %184 = vector.extract_strided_slice %182 {offsets = [1, 0], sizes = [1, 128], strides = [1, 1]} : vector<3x128xf32> to vector<1x128xf32>
    %185 = vector.extract_strided_slice %182 {offsets = [2, 0], sizes = [1, 128], strides = [1, 1]} : vector<3x128xf32> to vector<1x128xf32>
    %186 = arith.truncf %181 : vector<8x128xf32> to vector<8x128xbf16>
    %c0_68 = arith.constant 0 : index
    %c0_69 = arith.constant 0 : index
    %187 = vector.load %arg11[%c0_68, %c0_69] : memref<128x128xbf16, #tpu.memory_space<vmem>>, vector<128x128xbf16>
    %cst_70 = arith.constant dense<0.000000e+00> : vector<8x128xf32>
    %188 = tpu.matmul %186, %187, %cst_70 {dimension_numbers = #tpu.dot_dimension_numbers<[1], [0], [0], [1], [0, 0, 1, 1], [], []>} : vector<8x128xbf16>, vector<128x128xbf16>, vector<8x128xf32> -> vector<8x128xf32>
    %189 = vector.broadcast %183 : vector<1x128xf32> to vector<8x128xf32>
    %190 = arith.addf %188, %189 : vector<8x128xf32>
    %191 = tpu.iota {dimensions = array<i32: 1>} : vector<8x128xi32>
    %c64_i32_71 = arith.constant 64 : i32
    %192 = vector.broadcast %c64_i32_71 : i32 to vector<8x128xi32>
    %193 = arith.cmpi slt, %191, %192 : vector<8x128xi32>
    %cst_72 = arith.constant 0.000000e+00 : f32
    %194 = vector.broadcast %cst_72 : f32 to vector<8x128xf32>
    %195 = arith.select %193, %190, %194 : vector<8x128xi1>, vector<8x128xf32>
    %cst_73 = arith.constant dense<0.000000e+00> : vector<8xf32>
    %196 = vector.multi_reduction <add>, %195, %cst_73 [1] : vector<8x128xf32> to vector<8xf32>
    %197 = vector.shape_cast %196 : vector<8xf32> to vector<8x1xf32>
    %cst_74 = arith.constant 1.562500e-02 : f32
    %198 = vector.broadcast %cst_74 : f32 to vector<8x1xf32>
    %199 = arith.mulf %197, %198 : vector<8x1xf32>
    %200 = vector.broadcast %199 : vector<8x1xf32> to vector<8x128xf32>
    %201 = arith.subf %190, %200 : vector<8x128xf32>
    %cst_75 = arith.constant 0.000000e+00 : f32
    %202 = vector.broadcast %cst_75 : f32 to vector<8x128xf32>
    %203 = arith.select %193, %201, %202 : vector<8x128xi1>, vector<8x128xf32>
    %204 = arith.mulf %203, %203 : vector<8x128xf32>
    %cst_76 = arith.constant dense<0.000000e+00> : vector<8xf32>
    %205 = vector.multi_reduction <add>, %204, %cst_76 [1] : vector<8x128xf32> to vector<8xf32>
    %206 = vector.shape_cast %205 : vector<8xf32> to vector<8x1xf32>
    %cst_77 = arith.constant 1.562500e-02 : f32
    %207 = vector.broadcast %cst_77 : f32 to vector<8x1xf32>
    %208 = arith.mulf %206, %207 : vector<8x1xf32>
    %cst_78 = arith.constant 9.99999974E-6 : f32
    %209 = vector.broadcast %cst_78 : f32 to vector<8x1xf32>
    %210 = arith.addf %208, %209 : vector<8x1xf32>
    %211 = math.rsqrt %210 : vector<8x1xf32>
    %212 = vector.broadcast %211 : vector<8x1xf32> to vector<8x128xf32>
    %213 = arith.mulf %203, %212 : vector<8x128xf32>
    %214 = vector.broadcast %184 : vector<1x128xf32> to vector<8x128xf32>
    %215 = arith.mulf %213, %214 : vector<8x128xf32>
    %216 = vector.broadcast %185 : vector<1x128xf32> to vector<8x128xf32>
    %217 = arith.addf %215, %216 : vector<8x128xf32>
    %c0_79 = arith.constant 0 : index
    %c0_80 = arith.constant 0 : index
    %218 = vector.load %arg13[%c0_79, %c0_80] : memref<8x128xf32, #tpu.memory_space<vmem>>, vector<8x128xf32>
    tpu.vector_store %arg13[%c0_79, %c0_80], %217 {strides = array<i32>} : memref<8x128xf32, #tpu.memory_space<vmem>>, vector<8x128xf32>,
    return
  }
  func.func @transform_0(%arg0: i32) -> (i32, i32) {
    %c0_i32 = arith.constant 0 : i32
    %c0_i32_0 = arith.constant 0 : i32
    return %arg0, %c0_i32 : i32, i32
  }
  func.func @transform_1(%arg0: i32) -> (i32, i32) {
    %c0_i32 = arith.constant 0 : i32
    %c0_i32_0 = arith.constant 0 : i32
    %c0_i32_1 = arith.constant 0 : i32
    return %c0_i32, %c0_i32_0 : i32, i32
  }
  func.func @transform_2(%arg0: i32) -> (i32, i32) {
    %c0_i32 = arith.constant 0 : i32
    %c0_i32_0 = arith.constant 0 : i32
    %c0_i32_1 = arith.constant 0 : i32
    return %c0_i32, %c0_i32_0 : i32, i32
  }
  func.func @transform_3(%arg0: i32) -> (i32, i32) {
    %c0_i32 = arith.constant 0 : i32
    %c0_i32_0 = arith.constant 0 : i32
    %c0_i32_1 = arith.constant 0 : i32
    return %c0_i32, %c0_i32_0 : i32, i32
  }
  func.func @transform_4(%arg0: i32) -> (i32, i32) {
    %c0_i32 = arith.constant 0 : i32
    %c0_i32_0 = arith.constant 0 : i32
    %c0_i32_1 = arith.constant 0 : i32
    return %c0_i32, %c0_i32_0 : i32, i32
  }
  func.func @transform_5(%arg0: i32) -> (i32, i32) {
    %c0_i32 = arith.constant 0 : i32
    %c0_i32_0 = arith.constant 0 : i32
    %c0_i32_1 = arith.constant 0 : i32
    return %c0_i32, %c0_i32_0 : i32, i32
  }
  func.func @transform_6(%arg0: i32) -> (i32, i32) {
    %c0_i32 = arith.constant 0 : i32
    %c0_i32_0 = arith.constant 0 : i32
    %c0_i32_1 = arith.constant 0 : i32
    return %c0_i32, %c0_i32_0 : i32, i32
  }
  func.func @transform_7(%arg0: i32) -> (i32, i32) {
    %c0_i32 = arith.constant 0 : i32
    %c0_i32_0 = arith.constant 0 : i32
    %c0_i32_1 = arith.constant 0 : i32
    return %c0_i32, %c0_i32_0 : i32, i32
  }
  func.func @transform_8(%arg0: i32) -> (i32, i32) {
    %c0_i32 = arith.constant 0 : i32
    %c0_i32_0 = arith.constant 0 : i32
    %c0_i32_1 = arith.constant 0 : i32
    return %c0_i32, %c0_i32_0 : i32, i32
  }
  func.func @transform_9(%arg0: i32) -> (i32, i32) {
    %c0_i32 = arith.constant 0 : i32
    %c0_i32_0 = arith.constant 0 : i32
    %c0_i32_1 = arith.constant 0 : i32
    return %c0_i32, %c0_i32_0 : i32, i32
  }
  func.func @transform_10(%arg0: i32) -> (i32, i32) {
    %c0_i32 = arith.constant 0 : i32
    %c0_i32_0 = arith.constant 0 : i32
    %c0_i32_1 = arith.constant 0 : i32
    return %c0_i32, %c0_i32_0 : i32, i32
  }
  func.func @transform_11(%arg0: i32) -> (i32, i32) {
    %c0_i32 = arith.constant 0 : i32
    %c0_i32_0 = arith.constant 0 : i32
    %c0_i32_1 = arith.constant 0 : i32
    return %c0_i32, %c0_i32_0 : i32, i32
  }
  func.func @transform_12(%arg0: i32) -> (i32, i32) {
    %c0_i32 = arith.constant 0 : i32
    %c0_i32_0 = arith.constant 0 : i32
    return %arg0, %c0_i32 : i32, i32
  }
}

module attributes {stable_mosaic.version = 11 : i64} {
  func.func @_fused_kernel(%arg0: i32, %arg1: memref<16x32xf32, #tpu.memory_space<vmem>>, %arg2: memref<8x16xbf16, #tpu.memory_space<vmem>>, %arg3: memref<32x128xbf16, #tpu.memory_space<vmem>>, %arg4: memref<3x128xf32, #tpu.memory_space<vmem>>, %arg5: memref<128x128xbf16, #tpu.memory_space<vmem>>, %arg6: memref<3x128xf32, #tpu.memory_space<vmem>>, %arg7: memref<128x128xbf16, #tpu.memory_space<vmem>>, %arg8: memref<3x128xf32, #tpu.memory_space<vmem>>, %arg9: memref<128x128xbf16, #tpu.memory_space<vmem>>, %arg10: memref<3x128xf32, #tpu.memory_space<vmem>>, %arg11: memref<128x128xbf16, #tpu.memory_space<vmem>>, %arg12: memref<3x128xf32, #tpu.memory_space<vmem>>, %arg13: memref<8x128xf32, #tpu.memory_space<vmem>>) attributes {dimension_semantics = [#tpu.dimension_semantics<parallel>], iteration_bounds = array<i64: 2>, scalar_prefetch = 0 : i64, scratch_operands = 0 : i64, tpu.core_type = #tpu.core_type<tc>, window_params = [{transform_indices = @transform_0, window_bounds = array<i64: 16, 32>}, {pipeline_mode = #tpu.pipeline_mode<synchronous>, transform_indices = @transform_1, window_bounds = array<i64: 8, 16>}, {pipeline_mode = #tpu.pipeline_mode<synchronous>, transform_indices = @transform_2, window_bounds = array<i64: 32, 128>}, {pipeline_mode = #tpu.pipeline_mode<synchronous>, transform_indices = @transform_3, window_bounds = array<i64: 3, 128>}, {pipeline_mode = #tpu.pipeline_mode<synchronous>, transform_indices = @transform_4, window_bounds = array<i64: 128, 128>}, {pipeline_mode = #tpu.pipeline_mode<synchronous>, transform_indices = @transform_5, window_bounds = array<i64: 3, 128>}, {pipeline_mode = #tpu.pipeline_mode<synchronous>, transform_indices = @transform_6, window_bounds = array<i64: 128, 128>}, {pipeline_mode = #tpu.pipeline_mode<synchronous>, transform_indices = @transform_7, window_bounds = array<i64: 3, 128>}, {pipeline_mode = #tpu.pipeline_mode<synchronous>, transform_indices = @transform_8, window_bounds = array<i64: 128, 128>}, {pipeline_mode = #tpu.pipeline_mode<synchronous>, transform_indices = @transform_9, window_bounds = array<i64: 3, 128>}, {pipeline_mode = #tpu.pipeline_mode<synchronous>, transform_indices = @transform_10, window_bounds = array<i64: 128, 128>}, {pipeline_mode = #tpu.pipeline_mode<synchronous>, transform_indices = @transform_11, window_bounds = array<i64: 3, 128>}, {transform_indices = @transform_12, window_bounds = array<i64: 8, 128>}]} {
    %c0 = arith.constant 0 : index
    %c0_0 = arith.constant 0 : index
    %0 = vector.load %arg1[%c0, %c0_0] : memref<16x32xf32, #tpu.memory_space<vmem>>, vector<16x32xf32>
    %c0_1 = arith.constant 0 : index
    %c0_2 = arith.constant 0 : index
    %1 = vector.load %arg4[%c0_1, %c0_2] : memref<3x128xf32, #tpu.memory_space<vmem>>, vector<3x128xf32>
    %2 = vector.extract_strided_slice %1 {offsets = [0, 0], sizes = [1, 128], strides = [1, 1]} : vector<3x128xf32> to vector<1x128xf32>
    %3 = vector.extract_strided_slice %1 {offsets = [1, 0], sizes = [1, 128], strides = [1, 1]} : vector<3x128xf32> to vector<1x128xf32>
    %4 = vector.extract_strided_slice %1 {offsets = [2, 0], sizes = [1, 128], strides = [1, 1]} : vector<3x128xf32> to vector<1x128xf32>
    %5 = arith.truncf %0 : vector<16x32xf32> to vector<16x32xbf16>
    %c0_3 = arith.constant 0 : index
    %c0_4 = arith.constant 0 : index
    %6 = vector.load %arg3[%c0_3, %c0_4] : memref<32x128xbf16, #tpu.memory_space<vmem>>, vector<32x128xbf16>
    %cst = arith.constant dense<0.000000e+00> : vector<16x128xf32>
    %7 = tpu.matmul %5, %6, %cst {dimension_numbers = #tpu.dot_dimension_numbers<[1], [0], [0], [1], [0, 0, 1, 1], [], []>} : vector<16x32xbf16>, vector<32x128xbf16>, vector<16x128xf32> -> vector<16x128xf32>
    %8 = vector.broadcast %2 : vector<1x128xf32> to vector<16x128xf32>
    %9 = arith.addf %7, %8 : vector<16x128xf32>
    %10 = tpu.iota {dimensions = array<i32: 1>} : vector<16x128xi32>
    %c64_i32 = arith.constant 64 : i32
    %11 = vector.broadcast %c64_i32 : i32 to vector<16x128xi32>
    %12 = arith.cmpi slt, %10, %11 : vector<16x128xi32>
    %cst_5 = arith.constant 0.000000e+00 : f32
    %13 = vector.broadcast %cst_5 : f32 to vector<16x128xf32>
    %14 = arith.select %12, %9, %13 : vector<16x128xi1>, vector<16x128xf32>
    %cst_6 = arith.constant dense<0.000000e+00> : vector<16xf32>
    %15 = vector.multi_reduction <add>, %14, %cst_6 [1] : vector<16x128xf32> to vector<16xf32>
    %16 = vector.shape_cast %15 : vector<16xf32> to vector<16x1xf32>
    %cst_7 = arith.constant 1.562500e-02 : f32
    %17 = vector.broadcast %cst_7 : f32 to vector<16x1xf32>
    %18 = arith.mulf %16, %17 : vector<16x1xf32>
    %19 = vector.broadcast %18 : vector<16x1xf32> to vector<16x128xf32>
    %20 = arith.subf %9, %19 : vector<16x128xf32>
    %cst_8 = arith.constant 0.000000e+00 : f32
    %21 = vector.broadcast %cst_8 : f32 to vector<16x128xf32>
    %22 = arith.select %12, %20, %21 : vector<16x128xi1>, vector<16x128xf32>
    %23 = arith.mulf %22, %22 : vector<16x128xf32>
    %cst_9 = arith.constant dense<0.000000e+00> : vector<16xf32>
    %24 = vector.multi_reduction <add>, %23, %cst_9 [1] : vector<16x128xf32> to vector<16xf32>
    %25 = vector.shape_cast %24 : vector<16xf32> to vector<16x1xf32>
    %cst_10 = arith.constant 1.562500e-02 : f32
    %26 = vector.broadcast %cst_10 : f32 to vector<16x1xf32>
    %27 = arith.mulf %25, %26 : vector<16x1xf32>
    %cst_11 = arith.constant 9.99999974E-6 : f32
    %28 = vector.broadcast %cst_11 : f32 to vector<16x1xf32>
    %29 = arith.addf %27, %28 : vector<16x1xf32>
    %30 = math.rsqrt %29 : vector<16x1xf32>
    %31 = vector.broadcast %30 : vector<16x1xf32> to vector<16x128xf32>
    %32 = arith.mulf %22, %31 : vector<16x128xf32>
    %33 = vector.broadcast %3 : vector<1x128xf32> to vector<16x128xf32>
    %34 = arith.mulf %32, %33 : vector<16x128xf32>
    %35 = vector.broadcast %4 : vector<1x128xf32> to vector<16x128xf32>
    %36 = arith.addf %34, %35 : vector<16x128xf32>
    %cst_12 = arith.constant 5.000000e-01 : f32
    %37 = vector.broadcast %cst_12 : f32 to vector<16x128xf32>
    %38 = arith.mulf %37, %36 : vector<16x128xf32>
    %cst_13 = arith.constant 0.707106769 : f32
    %39 = vector.broadcast %cst_13 : f32 to vector<16x128xf32>
    %40 = arith.mulf %36, %39 : vector<16x128xf32>
    %41 = math.erf %40 : vector<16x128xf32>
    %cst_14 = arith.constant 1.000000e+00 : f32
    %42 = vector.broadcast %cst_14 : f32 to vector<16x128xf32>
    %43 = arith.addf %42, %41 : vector<16x128xf32>
    %44 = arith.mulf %38, %43 : vector<16x128xf32>
    %c0_15 = arith.constant 0 : index
    %c0_16 = arith.constant 0 : index
    %45 = vector.load %arg6[%c0_15, %c0_16] : memref<3x128xf32, #tpu.memory_space<vmem>>, vector<3x128xf32>
    %46 = vector.extract_strided_slice %45 {offsets = [0, 0], sizes = [1, 128], strides = [1, 1]} : vector<3x128xf32> to vector<1x128xf32>
    %47 = vector.extract_strided_slice %45 {offsets = [1, 0], sizes = [1, 128], strides = [1, 1]} : vector<3x128xf32> to vector<1x128xf32>
    %48 = vector.extract_strided_slice %45 {offsets = [2, 0], sizes = [1, 128], strides = [1, 1]} : vector<3x128xf32> to vector<1x128xf32>
    %49 = arith.truncf %44 : vector<16x128xf32> to vector<16x128xbf16>
    %c0_17 = arith.constant 0 : index
    %c0_18 = arith.constant 0 : index
    %50 = vector.load %arg5[%c0_17, %c0_18] : memref<128x128xbf16, #tpu.memory_space<vmem>>, vector<128x128xbf16>
    %cst_19 = arith.constant dense<0.000000e+00> : vector<16x128xf32>
    %51 = tpu.matmul %49, %50, %cst_19 {dimension_numbers = #tpu.dot_dimension_numbers<[1], [0], [0], [1], [0, 0, 1, 1], [], []>} : vector<16x128xbf16>, vector<128x128xbf16>, vector<16x128xf32> -> vector<16x128xf32>
    %52 = vector.broadcast %46 : vector<1x128xf32> to vector<16x128xf32>
    %53 = arith.addf %51, %52 : vector<16x128xf32>
    %54 = tpu.iota {dimensions = array<i32: 1>} : vector<16x128xi32>
    %c64_i32_20 = arith.constant 64 : i32
    %55 = vector.broadcast %c64_i32_20 : i32 to vector<16x128xi32>
    %56 = arith.cmpi slt, %54, %55 : vector<16x128xi32>
    %cst_21 = arith.constant 0.000000e+00 : f32
    %57 = vector.broadcast %cst_21 : f32 to vector<16x128xf32>
    %58 = arith.select %56, %53, %57 : vector<16x128xi1>, vector<16x128xf32>
    %cst_22 = arith.constant dense<0.000000e+00> : vector<16xf32>
    %59 = vector.multi_reduction <add>, %58, %cst_22 [1] : vector<16x128xf32> to vector<16xf32>
    %60 = vector.shape_cast %59 : vector<16xf32> to vector<16x1xf32>
    %cst_23 = arith.constant 1.562500e-02 : f32
    %61 = vector.broadcast %cst_23 : f32 to vector<16x1xf32>
    %62 = arith.mulf %60, %61 : vector<16x1xf32>
    %63 = vector.broadcast %62 : vector<16x1xf32> to vector<16x128xf32>
    %64 = arith.subf %53, %63 : vector<16x128xf32>
    %cst_24 = arith.constant 0.000000e+00 : f32
    %65 = vector.broadcast %cst_24 : f32 to vector<16x128xf32>
    %66 = arith.select %56, %64, %65 : vector<16x128xi1>, vector<16x128xf32>
    %67 = arith.mulf %66, %66 : vector<16x128xf32>
    %cst_25 = arith.constant dense<0.000000e+00> : vector<16xf32>
    %68 = vector.multi_reduction <add>, %67, %cst_25 [1] : vector<16x128xf32> to vector<16xf32>
    %69 = vector.shape_cast %68 : vector<16xf32> to vector<16x1xf32>
    %cst_26 = arith.constant 1.562500e-02 : f32
    %70 = vector.broadcast %cst_26 : f32 to vector<16x1xf32>
    %71 = arith.mulf %69, %70 : vector<16x1xf32>
    %cst_27 = arith.constant 9.99999974E-6 : f32
    %72 = vector.broadcast %cst_27 : f32 to vector<16x1xf32>
    %73 = arith.addf %71, %72 : vector<16x1xf32>
    %74 = math.rsqrt %73 : vector<16x1xf32>
    %75 = vector.broadcast %74 : vector<16x1xf32> to vector<16x128xf32>
    %76 = arith.mulf %66, %75 : vector<16x128xf32>
    %77 = vector.broadcast %47 : vector<1x128xf32> to vector<16x128xf32>
    %78 = arith.mulf %76, %77 : vector<16x128xf32>
    %79 = vector.broadcast %48 : vector<1x128xf32> to vector<16x128xf32>
    %80 = arith.addf %78, %79 : vector<16x128xf32>
    %cst_28 = arith.constant 5.000000e-01 : f32
    %81 = vector.broadcast %cst_28 : f32 to vector<16x128xf32>
    %82 = arith.mulf %81, %80 : vector<16x128xf32>
    %cst_29 = arith.constant 0.707106769 : f32
    %83 = vector.broadcast %cst_29 : f32 to vector<16x128xf32>
    %84 = arith.mulf %80, %83 : vector<16x128xf32>
    %85 = math.erf %84 : vector<16x128xf32>
    %cst_30 = arith.constant 1.000000e+00 : f32
    %86 = vector.broadcast %cst_30 : f32 to vector<16x128xf32>
    %87 = arith.addf %86, %85 : vector<16x128xf32>
    %88 = arith.mulf %82, %87 : vector<16x128xf32>
    %c0_31 = arith.constant 0 : index
    %c0_32 = arith.constant 0 : index
    %89 = vector.load %arg8[%c0_31, %c0_32] : memref<3x128xf32, #tpu.memory_space<vmem>>, vector<3x128xf32>
    %90 = vector.extract_strided_slice %89 {offsets = [0, 0], sizes = [1, 128], strides = [1, 1]} : vector<3x128xf32> to vector<1x128xf32>
    %91 = vector.extract_strided_slice %89 {offsets = [1, 0], sizes = [1, 128], strides = [1, 1]} : vector<3x128xf32> to vector<1x128xf32>
    %92 = vector.extract_strided_slice %89 {offsets = [2, 0], sizes = [1, 128], strides = [1, 1]} : vector<3x128xf32> to vector<1x128xf32>
    %93 = arith.truncf %88 : vector<16x128xf32> to vector<16x128xbf16>
    %c0_33 = arith.constant 0 : index
    %c0_34 = arith.constant 0 : index
    %94 = vector.load %arg7[%c0_33, %c0_34] : memref<128x128xbf16, #tpu.memory_space<vmem>>, vector<128x128xbf16>
    %cst_35 = arith.constant dense<0.000000e+00> : vector<16x128xf32>
    %95 = tpu.matmul %93, %94, %cst_35 {dimension_numbers = #tpu.dot_dimension_numbers<[1], [0], [0], [1], [0, 0, 1, 1], [], []>} : vector<16x128xbf16>, vector<128x128xbf16>, vector<16x128xf32> -> vector<16x128xf32>
    %96 = vector.broadcast %90 : vector<1x128xf32> to vector<16x128xf32>
    %97 = arith.addf %95, %96 : vector<16x128xf32>
    %98 = tpu.iota {dimensions = array<i32: 1>} : vector<16x128xi32>
    %c64_i32_36 = arith.constant 64 : i32
    %99 = vector.broadcast %c64_i32_36 : i32 to vector<16x128xi32>
    %100 = arith.cmpi slt, %98, %99 : vector<16x128xi32>
    %cst_37 = arith.constant 0.000000e+00 : f32
    %101 = vector.broadcast %cst_37 : f32 to vector<16x128xf32>
    %102 = arith.select %100, %97, %101 : vector<16x128xi1>, vector<16x128xf32>
    %cst_38 = arith.constant dense<0.000000e+00> : vector<16xf32>
    %103 = vector.multi_reduction <add>, %102, %cst_38 [1] : vector<16x128xf32> to vector<16xf32>
    %104 = vector.shape_cast %103 : vector<16xf32> to vector<16x1xf32>
    %cst_39 = arith.constant 1.562500e-02 : f32
    %105 = vector.broadcast %cst_39 : f32 to vector<16x1xf32>
    %106 = arith.mulf %104, %105 : vector<16x1xf32>
    %107 = vector.broadcast %106 : vector<16x1xf32> to vector<16x128xf32>
    %108 = arith.subf %97, %107 : vector<16x128xf32>
    %cst_40 = arith.constant 0.000000e+00 : f32
    %109 = vector.broadcast %cst_40 : f32 to vector<16x128xf32>
    %110 = arith.select %100, %108, %109 : vector<16x128xi1>, vector<16x128xf32>
    %111 = arith.mulf %110, %110 : vector<16x128xf32>
    %cst_41 = arith.constant dense<0.000000e+00> : vector<16xf32>
    %112 = vector.multi_reduction <add>, %111, %cst_41 [1] : vector<16x128xf32> to vector<16xf32>
    %113 = vector.shape_cast %112 : vector<16xf32> to vector<16x1xf32>
    %cst_42 = arith.constant 1.562500e-02 : f32
    %114 = vector.broadcast %cst_42 : f32 to vector<16x1xf32>
    %115 = arith.mulf %113, %114 : vector<16x1xf32>
    %cst_43 = arith.constant 9.99999974E-6 : f32
    %116 = vector.broadcast %cst_43 : f32 to vector<16x1xf32>
    %117 = arith.addf %115, %116 : vector<16x1xf32>
    %118 = math.rsqrt %117 : vector<16x1xf32>
    %119 = vector.broadcast %118 : vector<16x1xf32> to vector<16x128xf32>
    %120 = arith.mulf %110, %119 : vector<16x128xf32>
    %121 = vector.broadcast %91 : vector<1x128xf32> to vector<16x128xf32>
    %122 = arith.mulf %120, %121 : vector<16x128xf32>
    %123 = vector.broadcast %92 : vector<1x128xf32> to vector<16x128xf32>
    %124 = arith.addf %122, %123 : vector<16x128xf32>
    %cst_44 = arith.constant 5.000000e-01 : f32
    %125 = vector.broadcast %cst_44 : f32 to vector<16x128xf32>
    %126 = arith.mulf %125, %124 : vector<16x128xf32>
    %cst_45 = arith.constant 0.707106769 : f32
    %127 = vector.broadcast %cst_45 : f32 to vector<16x128xf32>
    %128 = arith.mulf %124, %127 : vector<16x128xf32>
    %129 = math.erf %128 : vector<16x128xf32>
    %cst_46 = arith.constant 1.000000e+00 : f32
    %130 = vector.broadcast %cst_46 : f32 to vector<16x128xf32>
    %131 = arith.addf %130, %129 : vector<16x128xf32>
    %132 = arith.mulf %126, %131 : vector<16x128xf32>
    %c0_47 = arith.constant 0 : index
    %c0_48 = arith.constant 0 : index
    %133 = vector.load %arg2[%c0_47, %c0_48] : memref<8x16xbf16, #tpu.memory_space<vmem>>, vector<8x16xbf16>
    %134 = arith.truncf %132 : vector<16x128xf32> to vector<16x128xbf16>
    %cst_49 = arith.constant dense<0.000000e+00> : vector<8x128xf32>
    %135 = tpu.matmul %133, %134, %cst_49 {dimension_numbers = #tpu.dot_dimension_numbers<[1], [0], [0], [1], [0, 0, 1, 1], [], []>} : vector<8x16xbf16>, vector<16x128xbf16>, vector<8x128xf32> -> vector<8x128xf32>
    %cst_50 = arith.constant 5.000000e-01 : f32
    %136 = vector.broadcast %cst_50 : f32 to vector<8x128xf32>
    %137 = arith.mulf %135, %136 : vector<8x128xf32>
    %c0_51 = arith.constant 0 : index
    %c0_52 = arith.constant 0 : index
    %138 = vector.load %arg10[%c0_51, %c0_52] : memref<3x128xf32, #tpu.memory_space<vmem>>, vector<3x128xf32>
    %139 = vector.extract_strided_slice %138 {offsets = [0, 0], sizes = [1, 128], strides = [1, 1]} : vector<3x128xf32> to vector<1x128xf32>
    %140 = vector.extract_strided_slice %138 {offsets = [1, 0], sizes = [1, 128], strides = [1, 1]} : vector<3x128xf32> to vector<1x128xf32>
    %141 = vector.extract_strided_slice %138 {offsets = [2, 0], sizes = [1, 128], strides = [1, 1]} : vector<3x128xf32> to vector<1x128xf32>
    %142 = arith.truncf %137 : vector<8x128xf32> to vector<8x128xbf16>
    %c0_53 = arith.constant 0 : index
    %c0_54 = arith.constant 0 : index
    %143 = vector.load %arg9[%c0_53, %c0_54] : memref<128x128xbf16, #tpu.memory_space<vmem>>, vector<128x128xbf16>
    %cst_55 = arith.constant dense<0.000000e+00> : vector<8x128xf32>
    %144 = tpu.matmul %142, %143, %cst_55 {dimension_numbers = #tpu.dot_dimension_numbers<[1], [0], [0], [1], [0, 0, 1, 1], [], []>} : vector<8x128xbf16>, vector<128x128xbf16>, vector<8x128xf32> -> vector<8x128xf32>
    %145 = vector.broadcast %139 : vector<1x128xf32> to vector<8x128xf32>
    %146 = arith.addf %144, %145 : vector<8x128xf32>
    %147 = tpu.iota {dimensions = array<i32: 1>} : vector<8x128xi32>
    %c32_i32 = arith.constant 32 : i32
    %148 = vector.broadcast %c32_i32 : i32 to vector<8x128xi32>
    %149 = arith.cmpi slt, %147, %148 : vector<8x128xi32>
    %cst_56 = arith.constant 0.000000e+00 : f32
    %150 = vector.broadcast %cst_56 : f32 to vector<8x128xf32>
    %151 = arith.select %149, %146, %150 : vector<8x128xi1>, vector<8x128xf32>
    %cst_57 = arith.constant dense<0.000000e+00> : vector<8xf32>
    %152 = vector.multi_reduction <add>, %151, %cst_57 [1] : vector<8x128xf32> to vector<8xf32>
    %153 = vector.shape_cast %152 : vector<8xf32> to vector<8x1xf32>
    %cst_58 = arith.constant 3.125000e-02 : f32
    %154 = vector.broadcast %cst_58 : f32 to vector<8x1xf32>
    %155 = arith.mulf %153, %154 : vector<8x1xf32>
    %156 = vector.broadcast %155 : vector<8x1xf32> to vector<8x128xf32>
    %157 = arith.subf %146, %156 : vector<8x128xf32>
    %cst_59 = arith.constant 0.000000e+00 : f32
    %158 = vector.broadcast %cst_59 : f32 to vector<8x128xf32>
    %159 = arith.select %149, %157, %158 : vector<8x128xi1>, vector<8x128xf32>
    %160 = arith.mulf %159, %159 : vector<8x128xf32>
    %cst_60 = arith.constant dense<0.000000e+00> : vector<8xf32>
    %161 = vector.multi_reduction <add>, %160, %cst_60 [1] : vector<8x128xf32> to vector<8xf32>
    %162 = vector.shape_cast %161 : vector<8xf32> to vector<8x1xf32>
    %cst_61 = arith.constant 3.125000e-02 : f32
    %163 = vector.broadcast %cst_61 : f32 to vector<8x1xf32>
    %164 = arith.mulf %162, %163 : vector<8x1xf32>
    %cst_62 = arith.constant 9.99999974E-6 : f32
    %165 = vector.broadcast %cst_62 : f32 to vector<8x1xf32>
    %166 = arith.addf %164, %165 : vector<8x1xf32>
    %167 = math.rsqrt %166 : vector<8x1xf32>
    %168 = vector.broadcast %167 : vector<8x1xf32> to vector<8x128xf32>
    %169 = arith.mulf %159, %168 : vector<8x128xf32>
    %170 = vector.broadcast %140 : vector<1x128xf32> to vector<8x128xf32>
    %171 = arith.mulf %169, %170 : vector<8x128xf32>
    %172 = vector.broadcast %141 : vector<1x128xf32> to vector<8x128xf32>
    %173 = arith.addf %171, %172 : vector<8x128xf32>
    %cst_63 = arith.constant 5.000000e-01 : f32
    %174 = vector.broadcast %cst_63 : f32 to vector<8x128xf32>
    %175 = arith.mulf %174, %173 : vector<8x128xf32>
    %cst_64 = arith.constant 0.707106769 : f32
    %176 = vector.broadcast %cst_64 : f32 to vector<8x128xf32>
    %177 = arith.mulf %173, %176 : vector<8x128xf32>
    %178 = math.erf %177 : vector<8x128xf32>
    %cst_65 = arith.constant 1.000000e+00 : f32
    %179 = vector.broadcast %cst_65 : f32 to vector<8x128xf32>
    %180 = arith.addf %179, %178 : vector<8x128xf32>
    %181 = arith.mulf %175, %180 : vector<8x128xf32>
    %c0_66 = arith.constant 0 : index
    %c0_67 = arith.constant 0 : index
    %182 = vector.load %arg12[%c0_66, %c0_67] : memref<3x128xf32, #tpu.memory_space<vmem>>, vector<3x128xf32>
    %183 = vector.extract_strided_slice %182 {offsets = [0, 0], sizes = [1, 128], strides = [1, 1]} : vector<3x128xf32> to vector<1x128xf32>
    %184 = vector.extract_strided_slice %182 {offsets = [1, 0], sizes = [1, 128], strides = [1, 1]} : vector<3x128xf32> to vector<1x128xf32>
    %185 = vector.extract_strided_slice %182 {offsets = [2, 0], sizes = [1, 128], strides = [1, 1]} : vector<3x128xf32> to vector<1x128xf32>
    %186 = arith.truncf %181 : vector<8x128xf32> to vector<8x128xbf16>
    %c0_68 = arith.constant 0 : index
    %c0_69 = arith.constant 0 : index
    %187 = vector.load %arg11[%c0_68, %c0_69] : memref<128x128xbf16, #tpu.memory_space<vmem>>, vector<128x128xbf16>
    %cst_70 = arith.constant dense<0.000000e+00> : vector<8x128xf32>
    %188 = tpu.matmul %186, %187, %cst_70 {dimension_numbers = #tpu.dot_dimension_numbers<[1], [0], [0], [1], [0, 0, 1, 1], [], []>} : vector<8x128xbf16>, vector<128x128xbf16>, vector<8x128xf32> -> vector<8x128xf32>
    %189 = vector.broadcast %183 : vector<1x128xf32> to vector<8x128xf32>
    %190 = arith.addf %188, %189 : vector<8x128xf32>
    %191 = tpu.iota {dimensions = array<i32: 1>} : vector<8x128xi32>
    %c64_i32_71 = arith.constant 64 : i32
    %192 = vector.broadcast %c64_i32_71 : i32 to vector<8x128xi32>
    %193 = arith.cmpi slt, %191, %192 : vector<8x128xi32>
    %cst_72 = arith.constant 0.000000e+00 : f32
    %194 = vector.broadcast %cst_72 : f32 to vector<8x128xf32>
    %195 = arith.select %193, %190, %194 : vector<8x128xi1>, vector<8x128xf32>
    %cst_73 = arith.constant dense<0.000000e+00> : vector<8xf32>
    %196 = vector.multi_reduction <add>, %195, %cst_73 [1] : vector<8x128xf32> to vector<8xf32>
    %197 = vector.shape_cast %196 : vector<8xf32> to vector<8x1xf32>
    %cst_74 = arith.constant 1.562500e-02 : f32
    %198 = vector.broadcast %cst_74 : f32 to vector<8x1xf32>
    %199 = arith.mulf %197, %198 : vector<8x1xf32>
    %200 = vector.broadcast %199 : vector<8x1xf32> to vector<8x128xf32>
    %201 = arith.subf %190, %200 : vector<8x128xf32>
    %cst_75 = arith.constant 0.000000e+00 : f32
    %202 = vector.broadcast %cst_75 : f32 to vector<8x128xf32>
    %203 = arith.select %193, %201, %202 : vector<8x128xi1>, vector<8x128xf32>
    %204 = arith.mulf %203, %203 : vector<8x128xf32>
    %cst_76 = arith.constant dense<0.000000e+00> : vector<8xf32>
    %205 = vector.multi_reduction <add>, %204, %cst_76 [1] : vector<8x128xf32> to vector<8xf32>
    %206 = vector.shape_cast %205 : vector<8xf32> to vector<8x1xf32>
    %cst_77 = arith.constant 1.562500e-02 : f32
    %207 = vector.broadcast %cst_77 : f32 to vector<8x1xf32>
    %208 = arith.mulf %206, %207 : vector<8x1xf32>
    %cst_78 = arith.constant 9.99999974E-6 : f32
    %209 = vector.broadcast %cst_78 : f32 to vector<8x1xf32>
    %210 = arith.addf %208, %209 : vector<8x1xf32>
    %211 = math.rsqrt %210 : vector<8x1xf32>
    %212 = vector.broadcast %211 : vector<8x1xf32> to vector<8x128xf32>
    %213 = arith.mulf %203, %212 : vector<8x128xf32>
    %214 = vector.broadcast %184 : vector<1x128xf32> to vector<8x128xf32>
    %215 = arith.mulf %213, %214 : vector<8x128xf32>
    %216 = vector.broadcast %185 : vector<1x128xf32> to vector<8x128xf32>
    %217 = arith.addf %215, %216 : vector<8x128xf32>
    %c0_79 = arith.constant 0 : index
    %c0_80 = arith.constant 0 : index
    %218 = vector.load %arg13[%c0_79, %c0_80] : memref<8x128xf32, #tpu.memory_space<vmem>>, vector<8x128xf32>
    tpu.vector_store %arg13[%c0_79, %c0_80], %217 {strides = array<i32>} : memref<8x128xf32, #tpu.memory_space<vmem>>, vector<8x128xf32>,
    return
  }
  func.func @transform_0(%arg0: i32) -> (i32, i32) {
    %c0_i32 = arith.constant 0 : i32
    %c0_i32_0 = arith.constant 0 : i32
    return %arg0, %c0_i32 : i32, i32
  }
  func.func @transform_1(%arg0: i32) -> (i32, i32) {
    %c0_i32 = arith.constant 0 : i32
    %c0_i32_0 = arith.constant 0 : i32
    %c0_i32_1 = arith.constant 0 : i32
    return %c0_i32, %c0_i32_0 : i32, i32
  }
  func.func @transform_2(%arg0: i32) -> (i32, i32) {
    %c0_i32 = arith.constant 0 : i32
    %c0_i32_0 = arith.constant 0 : i32
    %c0_i32_1 = arith.constant 0 : i32
    return %c0_i32, %c0_i32_0 : i32, i32
  }
  func.func @transform_3(%arg0: i32) -> (i32, i32) {
    %c0_i32 = arith.constant 0 : i32
    %c0_i32_0 = arith.constant 0 : i32
    %c0_i32_1 = arith.constant 0 : i32
    return %c0_i32, %c0_i32_0 : i32, i32
  }
  func.func @transform_4(%arg0: i32) -> (i32, i32) {
    %c0_i32 = arith.constant 0 : i32
    %c0_i32_0 = arith.constant 0 : i32
    %c0_i32_1 = arith.constant 0 : i32
    return %c0_i32, %c0_i32_0 : i32, i32
  }
  func.func @transform_5(%arg0: i32) -> (i32, i32) {
    %c0_i32 = arith.constant 0 : i32
    %c0_i32_0 = arith.constant 0 : i32
    %c0_i32_1 = arith.constant 0 : i32
    return %c0_i32, %c0_i32_0 : i32, i32
  }
  func.func @transform_6(%arg0: i32) -> (i32, i32) {
    %c0_i32 = arith.constant 0 : i32
    %c0_i32_0 = arith.constant 0 : i32
    %c0_i32_1 = arith.constant 0 : i32
    return %c0_i32, %c0_i32_0 : i32, i32
  }
  func.func @transform_7(%arg0: i32) -> (i32, i32) {
    %c0_i32 = arith.constant 0 : i32
    %c0_i32_0 = arith.constant 0 : i32
    %c0_i32_1 = arith.constant 0 : i32
    return %c0_i32, %c0_i32_0 : i32, i32
  }
  func.func @transform_8(%arg0: i32) -> (i32, i32) {
    %c0_i32 = arith.constant 0 : i32
    %c0_i32_0 = arith.constant 0 : i32
    %c0_i32_1 = arith.constant 0 : i32
    return %c0_i32, %c0_i32_0 : i32, i32
  }
  func.func @transform_9(%arg0: i32) -> (i32, i32) {
    %c0_i32 = arith.constant 0 : i32
    %c0_i32_0 = arith.constant 0 : i32
    %c0_i32_1 = arith.constant 0 : i32
    return %c0_i32, %c0_i32_0 : i32, i32
  }
  func.func @transform_10(%arg0: i32) -> (i32, i32) {
    %c0_i32 = arith.constant 0 : i32
    %c0_i32_0 = arith.constant 0 : i32
    %c0_i32_1 = arith.constant 0 : i32
    return %c0_i32, %c0_i32_0 : i32, i32
  }
  func.func @transform_11(%arg0: i32) -> (i32, i32) {
    %c0_i32 = arith.constant 0 : i32
    %c0_i32_0 = arith.constant 0 : i32
    %c0_i32_1 = arith.constant 0 : i32
    return %c0_i32, %c0_i32_0 : i32, i32
  }
  func.func @transform_12(%arg0: i32) -> (i32, i32) {
    %c0_i32 = arith.constant 0 : i32
    %c0_i32_0 = arith.constant 0 : i32
    return %arg0, %c0_i32 : i32, i32
  }
}

</mosaic_0001>

<bundles_post_ra>
// kernel: tpu_custom_call.1
= control target key start
LH: loop header
LB: loop body
LE: loop exit
PB: predicated region body
PF: predicated region fallthrough
CT: control target
= control target key end

     0   :  { %s2494_s0 = inlined_call_operand.hbm [shape: f32[32,32], index: 0, kind: input, shape index: {}]   ;;  %s2495_s1 = inlined_call_operand.hbm [shape: bf16[8,16], index: 1, kind: input, shape index: {}]   ;;  %s2496_s2 = inlined_call_operand.hbm [shape: bf16[32,128], index: 2, kind: input, shape index: {}]   ;;  %s2497_s3 = inlined_call_operand.vmem [shape: f32[3,128], index: 3, kind: input, shape index: {}]   ;;  %s2498_s4 = inlined_call_operand.hbm [shape: bf16[128,128], index: 4, kind: input, shape index: {}]   ;;  %s2499_s5 = inlined_call_operand.vmem [shape: f32[3,128], index: 5, kind: input, shape index: {}]   ;;  %s2500_s6 = inlined_call_operand.hbm [shape: bf16[128,128], index: 6, kind: input, shape index: {}]   ;;  %s2501_s7 = inlined_call_operand.vmem [shape: f32[3,128], index: 7, kind: input, shape index: {}]   ;;  %s2502_s8 = inlined_call_operand.hbm [shape: bf16[128,128], index: 8, kind: input, shape index: {}]   ;;  %s2503_s9 = inlined_call_operand.vmem [shape: f32[3,128], index: 9, kind: input, shape index: {}]   ;;  %s2504_s10 = inlined_call_operand.hbm [shape: bf16[128,128], index: 10, kind: input, shape index: {}]   ;;  %s2505_s11 = inlined_call_operand.vmem [shape: f32[3,128], index: 11, kind: input, shape index: {}]   ;;  %s2506_s12 = inlined_call_operand.hbm [shape: f32[16,128], index: 12, kind: output, shape index: {}]  }
   0x1   :  { %2511 = sst [smem:[#allocation20_spill]] %s2495_s1 }
   0x2   :  { %2512 = sst [smem:[#allocation21_spill]] %s2496_s2 }
   0x3   :  { %2513 = sst [smem:[#allocation22_spill]] %s2498_s4 }
   0x4   :  { %2514 = sst [smem:[#allocation23_spill]] %s2500_s6 }
   0x5   :  { %2515 = sst [smem:[#allocation24_spill]] %s2502_s8 }
   0x6   :  { %2516 = sst [smem:[#allocation25_spill]] %s2504_s10 }
   0x7   :  { %17 = vsyncpa [#allocation3], 0 }
   0x8   :  { %19 = vsyncpa [#allocation3 + $0x1], 0 }
   0x9   :  { %20 = vsyncpa [#allocation6], 0 }
   0xa   :  { %21 = vsyncpa [#allocation9], 0 }
   0xb   :  { %22 = vsyncpa [#allocation12], 0 }
   0xc   :  { %23 = vsyncpa [#allocation4], 0 }
   0xd   :  { %25 = vsyncpa [#allocation4 + $0x1], 0  ;;  %s2133_s21 = smov 0   ;;  %s2135_s22 = smov 0  }
   0xe   :  { %s2137_s23 = smov 0   ;;  %s2139_s24 = smov 0  }
   0xf LB: > { %s2054_s25 = smov [#allocation5]   ;;  %s2154_s27 = sadd.s32 4294967295, %s2052_s24   ;;  %s2052_s24 = sphi %s2139_s24, %s2545_s24   ;;  %s2048_s23 = sphi %s2137_s23, %s2544_s23   ;;  %s2044_s22 = sphi %s2135_s22, %s2543_s22   ;;  %s2040_s21 = sphi %s2133_s21, %s2542_s21  }
  0x10   : > { %s332_s26 = sshll.u32 %s2054_s25, 4  ;;  %p1419_p0 = scmp.ge.s32.totalorder %s2052_s24, 1  ;;  %s333_s26 = int_to_ptr.vmem [resolvable:$true] %s332_s26 }
  0x11   : > { %p2507_p1 = scmp.eq.s32.totalorder %s2154_s27, 0  ;;  %p319_p2 = scmp.lt.s32.totalorder %s2052_s24, 3 }
  0x12   : > { %s2055_s29 = smov [#allocation8]   ;;  %s2056_s14 = smov [#allocation11]  }
  0x13   : > { %p2159_p3 = pnand %p1419_p0, %p319_p2  ;;  %s358_s30 = sshll.u32 %s2055_s29, 4  ;;  %s2172_s30 = int_to_ptr.vmem [resolvable:$true] %s358_s30 }
  0x14   : > { %s390_s15 = sshll.u32 %s2056_s14, 4  ;;  %s1803_s17 = scalar_lea.vmem %s333_s26, 64  ;;  %s2174_s15 = int_to_ptr.vmem [resolvable:$true] %s390_s15 }
  0x15   : > { %s2517_s28 = scalar_select %p2159_p3, 1, 0 }
  0x16   : > { %p1643_p5 = pneg %p2159_p3  ;;  %p1804_p8 = scmp.ne.s32.totalorder %s333_s26, %s1803_s17 }
  0x17   : > { %p1811_p11 = scmp.lt.s32.totalorder %s333_s26, %s333_s26  ;;  %p1812_p12 = scmp.lt.s32.totalorder %s1803_s17, %s1803_s17 }
  0x18   : > { %p2168_p6 = pnand %p1643_p5, %p2507_p1 }
  0x19   : > { %p1813_p13 = por %p1812_p12, %p1811_p11 }
  0x1a   : > { %p2178_p7 = pneg %p2168_p6 }
  0x1c   : > { %p1806_p9 = pnand %p1804_p8, %p2178_p7 }
  0x1e   : > { %p1807_p10 = pneg %p1806_p9 }
  0x20   : > { %p1814_p0 = pnand %p1813_p13, %p1807_p10 }
  0x22   : > { %1817 = shalt.err (!%p1814_p0)
}
  0x23   : > { %s2520_s1 = sld [smem:[#allocation20_spill]]  ;;  %s1829_s20 = scalar_lea.vmem %s2172_s30, 1024 }
  0x24   : > { %p1830_p2 = scmp.ne.s32.totalorder %s2172_s30, %s1829_s20  ;;  %p1837_p9 = scmp.lt.s32.totalorder %s2172_s30, %s2172_s30 }
  0x25   : > { %p1838_p11 = scmp.lt.s32.totalorder %s1829_s20, %s1829_s20 }
  0x26   : > { %p1832_p5 = pnand %p1830_p2, %p2178_p7 }
  0x27   : > { %p1839_p10 = por %p1838_p11, %p1837_p9 }
  0x28   : > { %p1833_p8 = pneg %p1832_p5 }
  0x29   : > { %1646 = dma.hbm_to_vmem [thread:$0]  (!%p2168_p6), %s2520_s1, 64, %s333_s26, [#allocation6]  }
  0x2a   : > { %p1840_p12 = pnand %p1839_p10, %p1833_p8 }
  0x2c   : > { %1843 = shalt.err (!%p1840_p12)
}
  0x2d   : > { %s2057_s25 = smov 64   ;;  %s2058_s29 = smov 4  }
  0x2e   : > { %s2521_s4 = sld [smem:[#allocation22_spill]]  ;;  %s1855_s17 = scalar_lea.vmem %s2174_s15, 1024 }
  0x2f   : > { %p1856_p13 = scmp.ne.s32.totalorder %s2174_s15, %s1855_s17  ;;  %p1863_p5 = scmp.lt.s32.totalorder %s2174_s15, %s2174_s15 }
  0x30   : > { %p1864_p8 = scmp.lt.s32.totalorder %s1855_s17, %s1855_s17 }
  0x31   : > { %p1858_p0 = pnand %p1856_p13, %p2178_p7 }
  0x32   : > { %p1865_p9 = por %p1864_p8, %p1863_p5 }
  0x33   : > { %p1859_p2 = pneg %p1858_p0 }
  0x34   : > { %1652 = dma.hbm_to_vmem [thread:$0]  (!%p2168_p6), %s2521_s4, 1024, %s2172_s30, [#allocation9], %s2057_s25, %s2057_s25, %s2058_s29  }
  0x35   : > { %p1866_p11 = pnand %p1865_p9, %p1859_p2 }
  0x37   : > { %1869 = shalt.err (!%p1866_p11)
}
  0x38   : > { %s2522_s8 = sld [smem:[#allocation24_spill]]  ;;  %s2059_s30 = smov [#allocation7]  }
  0x39   : > { %s342_s20 = sshll.u32 %s2059_s30, 4  ;;  %s2060_s26 = smov [#allocation10]   ;;  %s343_s20 = int_to_ptr.vmem [resolvable:$true] %s342_s20 }
  0x3a   : > { %s374_s14 = sshll.u32 %s2060_s26, 4  ;;  %s1881_s17 = scalar_lea.vmem %s343_s20, 256  ;;  %s375_s14 = int_to_ptr.vmem [resolvable:$true] %s374_s14 }
  0x3b   : > { %p1882_p10 = scmp.ne.s32.totalorder %s343_s20, %s1881_s17  ;;  %p1889_p0 = scmp.lt.s32.totalorder %s343_s20, %s343_s20 }
  0x3c   : > { %p1890_p2 = scmp.lt.s32.totalorder %s1881_s17, %s1881_s17 }
  0x3d   : > { %p1884_p12 = pnand %p1882_p10, %p2178_p7 }
  0x3e   : > { %1658 = dma.hbm_to_vmem [thread:$0]  (!%p2168_p6), %s2522_s8, 1024, %s2174_s15, [#allocation12], %s2057_s25, %s2057_s25, %s2058_s29  }
  0x3f   : > { %p1885_p13 = pneg %p1884_p12  ;;  %p1891_p5 = por %p1890_p2, %p1889_p0 }
  0x41   : > { %p1892_p8 = pnand %p1891_p5, %p1885_p13 }
  0x43   : > { %1895 = shalt.err (!%p1892_p8)
}
  0x44   : > { %s2523_s2 = sld [smem:[#allocation21_spill]]  ;;  %s1907_s19 = scalar_lea.vmem %s375_s14, 1024 }
  0x45   : > { %p1908_p9 = scmp.ne.s32.totalorder %s375_s14, %s1907_s19  ;;  %p1915_p12 = scmp.lt.s32.totalorder %s375_s14, %s375_s14 }
  0x46   : > { %p1916_p0 = scmp.lt.s32.totalorder %s1907_s19, %s1907_s19 }
  0x47   : > { %p1910_p11 = pnand %p1908_p9, %p2178_p7 }
  0x48   : > { %p1917_p13 = por %p1916_p0, %p1915_p12 }
  0x49   : > { %p1911_p10 = pneg %p1910_p11 }
  0x4a   : > { %1649 = dma.hbm_to_vmem [thread:$0]  (!%p2168_p6), %s2523_s2, 256, %s343_s20, [#allocation6], %s2057_s25, %s2057_s25, %s2058_s29  }
  0x4b   : > { %p1918_p2 = pnand %p1917_p13, %p1911_p10 }
  0x4d   : > { %1921 = shalt.err (!%p1918_p2)
}
  0x4e   : > { %s2524_s6 = sld [smem:[#allocation23_spill]]  ;;  %s2061_s20 = smov [#allocation13]  }
  0x4f   : > { %s406_s17 = sshll.u32 %s2061_s20, 4  ;;  %s407_s17 = int_to_ptr.vmem [resolvable:$true] %s406_s17 }
  0x50   : > { %s1933_s15 = scalar_lea.vmem %s407_s17, 1024  ;;  %p1941_p11 = scmp.lt.s32.totalorder %s407_s17, %s407_s17 }
  0x51   : > { %p1934_p5 = scmp.ne.s32.totalorder %s407_s17, %s1933_s15  ;;  %p1942_p10 = scmp.lt.s32.totalorder %s1933_s15, %s1933_s15 }
  0x53   : > { %p1936_p8 = pnand %p1934_p5, %p2178_p7  ;;  %p1943_p12 = por %p1942_p10, %p1941_p11 }
  0x54   : > { %1655 = dma.hbm_to_vmem [thread:$0]  (!%p2168_p6), %s2524_s6, 1024, %s375_s14, [#allocation9], %s2057_s25, %s2057_s25, %s2058_s29  }
  0x55   : > { %p1937_p9 = pneg %p1936_p8 }
  0x57   : > { %p1944_p0 = pnand %p1943_p12, %p1937_p9 }
  0x59   : > { %1947 = shalt.err (!%p1944_p0)
}
  0x5a   : > { %s2525_s10 = sld [smem:[#allocation25_spill]]  ;;  %s1418_s13 = sadd.s32 4294967294, %s2052_s24  }
  0x5b   : > { %s2251_s16 = sadd.s32 1, %s2052_s24   ;;  %s38_s30 = sadd.s32 1, %s2048_s23 }
  0x5c   : > { %s35_s19 = ssub.s32 %s2052_s24, %s2251_s16  ;;  %p45_p13 = scmp.ne.s32.totalorder %s2048_s23, %s2044_s22 }
  0x5d   : > { %p36_p7 = scmp.eq.s32.totalorder %s35_s19, 0  ;;  %p46_p2 = scmp.eq.s32.totalorder %s2052_s24, 0 }
  0x5e   : > { %p51_p5 = scmp.ne.s32.totalorder %s2044_s22, %s2040_s21  ;;  %p306_p9 = scmp.eq.s32.totalorder %s2154_s27, 1 }
  0x5f   : > { %s2262_s26 = scalar_select %p36_p7, %s2048_s23, %s38_s30  }
  0x60   : > { %1661 = dma.hbm_to_vmem [thread:$0]  (!%p2168_p6), %s2525_s10, 1024, %s407_s17, [#allocation12], %s2057_s25, %s2057_s25, %s2058_s29  }
  0x61   : > { %p2264_p8 = por %p46_p2, %p45_p13  ;;  %p2270_p6 = por %p2507_p1, %p51_p5 }
  0x62   : > { %p312_p11 = scmp.eq.s32.totalorder %s1418_s13, 1  ;;  %p1676_p10 = scmp.lt.s32.totalorder %s2052_s24, 2 }
  0x63   : > { %s2527_s25 = scalar_select %p2270_p6, 1, 0 }
  0x64   : > { %s423_s29 = sand.u32 1, %s2048_s23   ;;  %p2277_p12 = por %p306_p9, %p45_p13 }
  0x65   : > { %p2281_p0 = por %p312_p11, %p51_p5  ;;  %s1427_s18 = sshll.u32 %s423_s29, 4 }
  0x66   : > { %s2528_s17 = scalar_select %p2277_p12, 1, 0 }
  0x67   : > { %s2529_s15 = scalar_select %p2281_p0, 1, 0 }
  0x68   : > { %s1479_s14 = sshll.u32 %s2052_s24, 8  ;;  %s427_s13 = scalar_lea.vmem [#allocation2], %s1427_s18 }
  0x69   : > { %s2289_s1 = scalar_lea.hbm %s2494_s0, %s1479_s14  ;;  %s434_s2 = sshll.u32 %s427_s13, 4  ;;  %s2291_s2 = int_to_ptr.vmem [resolvable:$true] %s434_s2 }
  0x6a   : > { %p2295_p7 = pnand %p1676_p10, %p2264_p8  ;;  %s2299_s6 = scalar_lea.sflag [#allocation3], %s423_s29 }
  0x6b   : > { %s1948_s8 = scalar_lea.hbm %s2289_s1, 256  ;;  %s1953_s18 = scalar_lea.hbm %s2494_s0, 512 }
  0x6c   : > { %p1949_p13 = scmp.ne.s32.totalorder %s2289_s1, %s1948_s8  ;;  %p1950_p2 = pneg %p2295_p7 }
  0x6d   : > { %p1954_p8 = scmp.lt.s32.totalorder %s2289_s1, %s2494_s0  ;;  %p1955_p11 = scmp.lt.s32.totalorder %s1953_s18, %s1948_s8 }
  0x6e   : > { %p1951_p5 = pnand %p1950_p2, %p1949_p13 }
  0x6f   : > { %p1956_p10 = por %p1955_p11, %p1954_p8 }
  0x70   : > { %p1952_p9 = pneg %p1951_p5 }
  0x72   : > { %p1957_p4 = pnand %p1956_p10, %p1952_p9 }
  0x74   : > { %1960 = shalt.err (!%p1957_p4)
}
  0x75   : > { %s1961_s20 = scalar_lea.vmem %s2291_s2, 256  ;;  %s2062_s29 = smov [#allocation2]  }
  0x76   : > { %p1962_p1 = scmp.ne.s32.totalorder %s2291_s2, %s1961_s20  ;;  %s1966_s10 = sshll.u32 %s2062_s29, 4  ;;  %s1967_s10 = int_to_ptr.vmem [resolvable:$false] %s1966_s10 }
  0x77   : > { %s1968_s14 = scalar_lea.vmem %s1967_s10, 512  ;;  %p1969_p5 = scmp.lt.s32.totalorder %s2291_s2, %s1967_s10 }
  0x78   : > { %p1964_p0 = pnand %p1962_p1, %p1950_p2  ;;  %p1970_p12 = scmp.lt.s32.totalorder %s1968_s14, %s1961_s20 }
  0x7a   : > { %p1965_p13 = pneg %p1964_p0  ;;  %p1971_p6 = por %p1970_p12, %p1969_p5 }
  0x7c   : > { %p1972_p3 = pnand %p1971_p6, %p1965_p13 }
  0x7e   : > { %1975 = shalt.err (!%p1972_p3)
}
  0x7f   : > { %s2063_s8 = smov 128   ;;  %s2064_s19 = smov 8  }
  0x80   : > { %1665 = dma.hbm_to_vmem [thread:$0]  (!%p2295_p7), %s2289_s1, 256, %s2291_s2, %s2299_s6, %s2063_s8, %s2063_s8, %s2064_s19  }
  0x81   : > { %p2531_p1 = scmp.ne.s32.totalorder %s2517_s28, 0 }
  0x82   : > { %s2323_s18 = sand.u32 (!%p2531_p1), 1, %s2044_s22   ;;  %p2532_p3 = scmp.ne.s32.totalorder (!%p2531_p1), %s2527_s25, 0 }
  0x83   : > { %446 = sbr.rel (%p2531_p1) target bundleno = 2985 (0xba9), region = 68  ;;  %s1431_s10 = sshll.u32 (!%p2531_p1), %s2323_s18, 4 }
  0x84   : > { %s449_s30 = scalar_lea.sflag (!%p2531_p1), [#allocation3], %s2323_s18  ;;  %s452_s13 = scalar_lea.vmem (!%p2531_p1), [#allocation2], %s1431_s10 }
  0x88   : > { %2019 = dma.done.wait (%p2532_p3), %s449_s30, 256  }
  0x89   : > { %2021 = vsyncadd (%p2532_p3), %s449_s30, 4294967040  ;;  %p2533_p4 = scmp.eq.s32.totalorder %s2154_s27, 0 }
  0x8b   : > { %2023 = dma.done.wait (%p2533_p4), [#allocation6], 320   ;;  %p2534_p6 = pmov %p2533_p4 }
  0x8c   : > { %p2535_p12 = pmov %p2533_p4 }
  0x8d   : > { %2025 = vsyncadd (%p2534_p6), [#allocation6], 4294966976 }
  0x8e   : > { %2027 = dma.done.wait (%p2535_p12), [#allocation9], 2048   ;;  %p2536_p0 = pmov %p2533_p4 }
  0x90   : > { %2029 = vsyncadd (%p2536_p0), [#allocation9], 4294965248  ;;  %p2537_p7 = pmov %p2536_p0 }
  0x91   : > { %p2538_p2 = pmov %p2536_p0 }
  0x92   : > { %2031 = dma.done.wait (%p2537_p7), [#allocation12], 2048  }
  0x93   : > { %2033 = vsyncadd (%p2538_p2), [#allocation12], 4294965248  ;;  %v2065_v0 = vmov 0.0   ;;  %vm2066_vm0 = vmmov 0   ;;  %v1728_v1 = vld [vmem:[#allocation7 + $0x8] sm:$0xff]   ;;  %v1729_v2 = vld [vmem:[#allocation7] sm:$0xff]   ;;  %v527_v6 = vlaneseq }
  0x94   : > { %1521 = vmatprep.subr.bf16.mxu0 %v2065_v0  ;;  %1525 = vmatprep.mubr.msk.bf16.mxu0 %vm2066_vm0, %v2065_v0  ;;  %v519_v3 = vld [vmem:[%s452_s13] sm:$0xff]  ;;  %v520_v4 = vld [vmem:[%s452_s13 + $0x8] sm:$0xff]  ;;  %vm543_vm1 = vcmask 261120   ;;  %vm959_vm3 = vcmask 130048   ;;  %s1438_s19 = sshll.u32 %s2323_s18, 3  ;;  %s1476_s10 = sshll.u32 %s2154_s27, 7 }
  0x95   : > { %1529 = vmatprep.subr.bf16.mxu1 %v2065_v0  ;;  %1545 = vmatprep.mubr.msk.bf16.mxu1 %vm2066_vm0, %v2065_v0  ;;  %v522_v5 = vpack.c.bf16 %v520_v4, %v519_v3  ;;  %v528_v7 = vshrl.u32 %v527_v6, 7  ;;  %v521_v9 = vld [vmem:[%s2497_s3] sm:$0x7]  ;;  %v2358_v10 = vand.u32 127, %v527_v6  ;;  %v1730_v30 = vld [vmem:[#allocation8 + $0x38] sm:$0xff]   ;;  %v1731_v31 = vld [vmem:[#allocation8 + $0x30] sm:$0xff]   ;;  %s1289_s4 = scalar_lea.hbm %s2506_s12, %s1476_s10 }
  0x96   : > { %1522 = vmatpush3.bf16.msra.mxu0 %v1728_v1  ;;  %1530 = vmatpush3.bf16.msra.mxu1 %v1730_v30  ;;  %v1732_v32 = vld [vmem:[#allocation8 + $0x28] sm:$0xff]   ;;  %v1733_v33 = vld [vmem:[#allocation8 + $0x20] sm:$0xff]   ;;  %v1734_v34 = vld [vmem:[#allocation8 + $0x18] sm:$0xff]   ;;  %s516_s30 = scalar_lea.vmem [#allocation14], %s1438_s19  ;;  %s1278_s6 = scalar_lea.sflag [#allocation4], %s2323_s18 }
  0x97   : > { %1523 = vmatprep.subr.bf16.mxu0 %v2065_v0  ;;  %v2353_v8 = vsub.s32 0, %v528_v7  ;;  %vm590_vm2 = vcmp.lt.s32.totalorder %v2358_v10, 64  ;;  %1531 = vmatprep.subr.bf16.mxu1 %v2065_v0  ;;  %v1735_v35 = vld [vmem:[#allocation8 + $0x10] sm:$0xff]   ;;  %v1736_v36 = vld [vmem:[#allocation8 + $0x8] sm:$0xff]   ;;  %v1737_v37 = vld [vmem:[#allocation8] sm:$0xff]   ;;  %v2378_v44 = vsub.s32 1, %v528_v7 }
  0x98   : > { %v2380_v45 = vsub.s32 2, %v528_v7  ;;  %v639_v4 = vld [vmem:[%s2499_s5] sm:$0x7]  ;;  %v1742_v30 = vld [vmem:[#allocation10 + $0x18] sm:$0xff]   ;;  %vm1114_vm4 = vcmp.lt.s32.totalorder %v2358_v10, 32  ;;  %s1291_s13 = sshll.u32 %s516_s30, 4  ;;  %s1292_s13 = int_to_ptr.vmem [resolvable:$true] %s1291_s13 }
  0x99   : > { %v530_v11 = vrot.slane %v521_v9, %v2353_v8  ;;  %v620_v46 = vrot.slane %v521_v9, %v2378_v44  ;;  %s1976_s28 = scalar_lea.vmem %s1292_s13, 128  ;;  %p2539_p8 = scmp.ne.s32.totalorder %s2528_s17, 0 }
  0x9a   : > { %1524 = vmatpush3.bf16.msra.mxu0 %v1729_v2  ;;  %1532 = vmatpush3.bf16.msra.mxu1 %v1731_v31  ;;  %v626_v48 = vrot.slane %v521_v9, %v2380_v45  ;;  %v1743_v31 = vld [vmem:[#allocation10 + $0x10] sm:$0xff]   ;;  %p1977_p9 = scmp.ne.s32.totalorder %s1292_s13, %s1976_s28  ;;  %s2067_s25 = smov [#allocation14]  }
  0x9b   : > { %1549 = vmatprep.subr.bf16.mxu0 %v2065_v0  ;;  %1533 = vmatprep.subr.bf16.mxu1 %v2065_v0  ;;  %s1980_s20 = sshll.u32 %s2067_s25, 4  ;;  %s1981_s20 = int_to_ptr.vmem [resolvable:$false] %s1980_s20 }
  0x9c   : > { %p1978_p11 = pnand %p1977_p9, %p2539_p8  ;;  %s1982_s27 = scalar_lea.vmem %s1981_s20, 256 }
  0x9d   : > { %1526 = vmatmul.mubr.msk.bf16.vlgmr.msra.gmra.mxu0 %vm543_vm1, %v522_v5  ;;  %v660_v5 = vrot.slane %v639_v4, %v2353_v8  ;;  %p1983_p13 = scmp.lt.s32.totalorder %s1292_s13, %s1981_s20  ;;  %p1984_p5 = scmp.lt.s32.totalorder %s1982_s27, %s1976_s28 }
  0x9e   : > { %1565 = vmatprep.mubr.msk.bf16.mxu0 %vm2066_vm0, %v2065_v0  ;;  %1534 = vmatpush3.bf16.msra.mxu1 %v1732_v32  ;;  %v1744_v32 = vld [vmem:[#allocation10 + $0x8] sm:$0xff]   ;;  %p1979_p10 = pneg %p1978_p11 }
  0x9f   : > { %1535 = vmatprep.subr.bf16.mxu1 %v2065_v0  ;;  %p1985_p1 = por %p1984_p5, %p1983_p13 }
  0xa1   : > { %p1986_p3 = pnand %p1985_p1, %p1979_p10 }
  0xa2   : > { %1536 = vmatpush3.bf16.msra.mxu1 %v1733_v33  ;;  %v1745_v33 = vld [vmem:[#allocation10] sm:$0xff]  }
  0xa3   : > { %1537 = vmatprep.subr.bf16.mxu1 %v2065_v0 }
  0xa6   : > { %1538 = vmatpush3.bf16.msra.mxu1 %v1734_v34 }
  0xa7   : > { %1539 = vmatprep.subr.bf16.mxu1 %v2065_v0 }
  0xaa   : > { %1540 = vmatpush3.bf16.msra.mxu1 %v1735_v35 }
  0xab   : > { %1541 = vmatprep.subr.bf16.mxu1 %v2065_v0 }
  0xae   : > { %1542 = vmatpush3.bf16.msra.mxu1 %v1736_v36 }
  0xaf   : > { %1543 = vmatprep.subr.bf16.mxu1 %v2065_v0 }
  0xb2   : > { %1544 = vmatpush3.bf16.msra.mxu1 %v1737_v37 }
  0xb3   : > { %1569 = vmatprep.subr.bf16.mxu1 %v2065_v0 }
 0x15d   : > { %v581_v12 = vpop.f32.mrf.mxu0 }
 0x15e   : > { %v582_v13 = vadd.f32 %v581_v12, %v530_v11 }
 0x15f   : > { %v1527_v14 = vpop.f32.mrf.mxu0 }
 0x160   : > { %v591_v15 = vsel %vm590_vm2, %v582_v13, 0.0 }
 0x161   : > { %593 = vadd.xlane.f32.xlu0 %v591_v15  ;;  %v584_v16 = vpop.f32.mrf.mxu0 }
 0x162   : > { %v585_v17 = vadd.f32 %v584_v16, %v530_v11 }
 0x163   : > { %v1528_v18 = vpop.f32.mrf.mxu0 }
 0x164   : > { %v592_v19 = vsel %vm590_vm2, %v585_v17, 0.0 }
 0x165   : > { %595 = vadd.xlane.f32.xlu0 %v592_v19 }
 0x1ea   : > { %v594_v20 = vpop.xlane.xlu0 %593 }
 0x1eb   : > { %v597_v21 = vmul.f32 0.015625, %v594_v20 }
 0x1ed   : > { %v599_v22 = vsub.f32 %v582_v13, %v597_v21 }
 0x1ee   : > { %v596_v23 = vpop.xlane.xlu0 %595 }
 0x1ef   : > { %v598_v24 = vmul.f32 0.015625, %v596_v23  ;;  %v601_v25 = vsel %vm590_vm2, %v599_v22, 0.0 }
 0x1f0   : > { %v603_v26 = vmul.f32 %v601_v25, %v601_v25 }
 0x1f1   : > { %v600_v27 = vsub.f32 %v585_v17, %v598_v24 }
 0x1f2   : > { %605 = vadd.xlane.f32.xlu1 %v603_v26  ;;  %v1738_v26 = vld [vmem:[#allocation10 + $0x38] sm:$0xff]  }
 0x1f3   : > { %v602_v28 = vsel %vm590_vm2, %v600_v27, 0.0  ;;  %1550 = vmatpush3.bf16.msra.mxu0 %v1738_v26  ;;  %v1739_v27 = vld [vmem:[#allocation10 + $0x30] sm:$0xff]   ;;  %v1750_v26 = vld [vmem:[#allocation11 + $0x18] sm:$0xff]  }
 0x1f4   : > { %v604_v29 = vmul.f32 %v602_v28, %v602_v28  ;;  %1551 = vmatprep.subr.bf16.mxu0 %v2065_v0 }
 0x1f6   : > { %607 = vadd.xlane.f32.xlu1 %v604_v29  ;;  %v1741_v29 = vld [vmem:[#allocation10 + $0x20] sm:$0xff]  }
 0x1f7   : > { %1552 = vmatpush3.bf16.msra.mxu0 %v1739_v27  ;;  %v1751_v27 = vld [vmem:[#allocation11 + $0x10] sm:$0xff]  }
 0x1f8   : > { %1553 = vmatprep.subr.bf16.mxu0 %v2065_v0 }
 0x27b   : > { %v606_v38 = vpop.xlane.xlu1 %605 }
 0x27c   : > { %v609_v39 = vmul.f32 0.015625, %v606_v38 }
 0x27e   : > { %v611_v40 = vadd.f32 1e-05, %v609_v39 }
 0x27f   : > { %v608_v41 = vpop.xlane.xlu1 %607 }
 0x280   : > { %1762 = vrsqrt.f32 %v611_v40  ;;  %v610_v42 = vmul.f32 0.015625, %v608_v41  ;;  %v779_v40 = vrot.slane %v639_v4, %v2378_v44 }
 0x282   : > { %v612_v43 = vadd.f32 1e-05, %v610_v42  ;;  %v785_v42 = vrot.slane %v639_v4, %v2380_v45 }
 0x284   : > { %1764 = vrsqrt.f32 %v612_v43 }
 0x28d   : > { %v1763_v47 = vpop.eup %1762 }
 0x28e   : > { %v615_v49 = vmul.f32 %v1763_v47, %v601_v25 }
 0x290   : > { %v621_v50 = vmul.f32 %v620_v46, %v615_v49 }
 0x291   : > { %v1765_v51 = vpop.eup %1764 }
 0x292   : > { %v616_v52 = vmul.f32 %v1765_v51, %v602_v28  ;;  %v627_v53 = vadd.f32 %v626_v48, %v621_v50  ;;  %v1740_v28 = vld [vmem:[#allocation10 + $0x28] sm:$0xff]  }
 0x293   : > { %1554 = vmatpush3.bf16.msra.mxu0 %v1740_v28  ;;  %v1752_v28 = vld [vmem:[#allocation11 + $0x8] sm:$0xff]  }
 0x294   : > { %v622_v54 = vmul.f32 %v620_v46, %v616_v52  ;;  %v631_v55 = vmul.f32 0.70710677, %v627_v53  ;;  %v629_v61 = vmul.f32 0.5, %v627_v53  ;;  %1555 = vmatprep.subr.bf16.mxu0 %v2065_v0 }
 0x296   : > { %v628_v56 = vadd.f32 %v626_v48, %v622_v54  ;;  %1766 = verf.f32 %v631_v55 }
 0x297   : > { %1556 = vmatpush3.bf16.msra.mxu0 %v1741_v29 }
 0x298   : > { %v632_v57 = vmul.f32 0.70710677, %v628_v56  ;;  %v630_v62 = vmul.f32 0.5, %v628_v56  ;;  %1557 = vmatprep.subr.bf16.mxu0 %v2065_v0 }
 0x29a   : > { %1768 = verf.f32 %v632_v57 }
 0x29b   : > { %1558 = vmatpush3.bf16.msra.mxu0 %v1742_v30 }
 0x29c   : > { %1559 = vmatprep.subr.bf16.mxu0 %v2065_v0 }
 0x29f   : > { %1560 = vmatpush3.bf16.msra.mxu0 %v1743_v31 }
 0x2a0   : > { %1561 = vmatprep.subr.bf16.mxu0 %v2065_v0 }
 0x2a3   : > { %v1767_v58 = vpop.eup %1766  ;;  %1562 = vmatpush3.bf16.msra.mxu0 %v1744_v32 }
 0x2a4   : > { %v635_v59 = vadd.f32 1.0, %v1767_v58  ;;  %1563 = vmatprep.subr.bf16.mxu0 %v2065_v0 }
 0x2a6   : > { %v637_v1 = vmul.f32 %v635_v59, %v629_v61 }
 0x2a7   : > { %v1769_v60 = vpop.eup %1768  ;;  %1564 = vmatpush3.bf16.msra.mxu0 %v1745_v33 }
 0x2a8   : > { %v636_v63 = vadd.f32 1.0, %v1769_v60  ;;  %1575 = vmatprep.subr.bf16.mxu0 %v2065_v0 }
 0x2aa   : > { %v638_v2 = vmul.f32 %v636_v63, %v630_v62  ;;  %v798_v63 = vld [vmem:[%s2501_s7] sm:$0x7] }
 0x2ac   : > { %v640_v3 = vpack.c.bf16 %v638_v2, %v637_v1  ;;  %v819_v1 = vrot.slane %v798_v63, %v2353_v8 }
 0x2ae   : > { %1546 = vmatmul.mubr.bf16.vlgmr.msra.gmra.mxu1 %v640_v3 }
 0x2af   : > { %1571 = vmatprep.mubr.msk.bf16.mxu1 %vm2066_vm0, %v2065_v0 }
 0x36e   : > { %v743_v6 = vpop.f32.mrf.mxu1 }
 0x36f   : > { %v744_v7 = vadd.f32 %v743_v6, %v660_v5 }
 0x370   : > { %v1547_v9 = vpop.f32.mrf.mxu1 }
 0x371   : > { %v750_v11 = vsel %vm590_vm2, %v744_v7, 0.0 }
 0x372   : > { %752 = vadd.xlane.f32.xlu0 %v750_v11  ;;  %v746_v12 = vpop.f32.mrf.mxu1 }
 0x373   : > { %v747_v13 = vadd.f32 %v746_v12, %v660_v5 }
 0x374   : > { %v1548_v14 = vpop.f32.mrf.mxu1 }
 0x375   : > { %v751_v15 = vsel %vm590_vm2, %v747_v13, 0.0 }
 0x376   : > { %754 = vadd.xlane.f32.xlu1 %v751_v15 }
 0x3fb   : > { %v753_v16 = vpop.xlane.xlu0 %752 }
 0x3fc   : > { %v756_v17 = vmul.f32 0.015625, %v753_v16 }
 0x3fe   : > { %v758_v18 = vsub.f32 %v744_v7, %v756_v17 }
 0x3ff   : > { %v755_v19 = vpop.xlane.xlu1 %754 }
 0x400   : > { %v757_v20 = vmul.f32 0.015625, %v755_v19  ;;  %v760_v21 = vsel %vm590_vm2, %v758_v18, 0.0 }
 0x401   : > { %v762_v22 = vmul.f32 %v760_v21, %v760_v21 }
 0x402   : > { %v759_v23 = vsub.f32 %v747_v13, %v757_v20 }
 0x403   : > { %764 = vadd.xlane.f32.xlu0 %v762_v22  ;;  %v1746_v22 = vld [vmem:[#allocation11 + $0x38] sm:$0xff]  }
 0x404   : > { %v761_v24 = vsel %vm590_vm2, %v759_v23, 0.0  ;;  %v1747_v23 = vld [vmem:[#allocation11 + $0x30] sm:$0xff]  }
 0x405   : > { %v763_v25 = vmul.f32 %v761_v24, %v761_v24 }
 0x407   : > { %766 = vadd.xlane.f32.xlu1 %v763_v25  ;;  %v1749_v25 = vld [vmem:[#allocation11 + $0x20] sm:$0xff]  }
 0x48c   : > { %v765_v34 = vpop.xlane.xlu0 %764 }
 0x48d   : > { %v768_v35 = vmul.f32 0.015625, %v765_v34 }
 0x48f   : > { %v770_v36 = vadd.f32 1e-05, %v768_v35  ;;  %v938_v35 = vrot.slane %v798_v63, %v2378_v44 }
 0x490   : > { %v767_v37 = vpop.xlane.xlu1 %766 }
 0x491   : > { %1770 = vrsqrt.f32 %v770_v36  ;;  %v769_v38 = vmul.f32 0.015625, %v767_v37  ;;  %v944_v37 = vrot.slane %v798_v63, %v2380_v45 }
 0x493   : > { %v771_v39 = vadd.f32 1e-05, %v769_v38 }
 0x495   : > { %1772 = vrsqrt.f32 %v771_v39 }
 0x49e   : > { %v1771_v41 = vpop.eup %1770 }
 0x49f   : > { %v774_v43 = vmul.f32 %v1771_v41, %v760_v21 }
 0x4a1   : > { %v780_v46 = vmul.f32 %v779_v40, %v774_v43 }
 0x4a2   : > { %v1773_v47 = vpop.eup %1772 }
 0x4a3   : > { %v775_v48 = vmul.f32 %v1773_v47, %v761_v24  ;;  %v786_v49 = vadd.f32 %v785_v42, %v780_v46  ;;  %v1748_v24 = vld [vmem:[#allocation11 + $0x28] sm:$0xff]  }
 0x4a5   : > { %v781_v50 = vmul.f32 %v779_v40, %v775_v48  ;;  %v790_v51 = vmul.f32 0.70710677, %v786_v49  ;;  %v788_v57 = vmul.f32 0.5, %v786_v49 }
 0x4a7   : > { %v787_v52 = vadd.f32 %v785_v42, %v781_v50  ;;  %1774 = verf.f32 %v790_v51 }
 0x4a9   : > { %v791_v53 = vmul.f32 0.70710677, %v787_v52  ;;  %v789_v58 = vmul.f32 0.5, %v787_v52 }
 0x4ab   : > { %1776 = verf.f32 %v791_v53 }
 0x4b4   : > { %v1775_v54 = vpop.eup %1774 }
 0x4b5   : > { %v794_v55 = vadd.f32 1.0, %v1775_v54 }
 0x4b7   : > { %v796_v60 = vmul.f32 %v794_v55, %v788_v57 }
 0x4b8   : > { %v1777_v56 = vpop.eup %1776 }
 0x4b9   : > { %v795_v59 = vadd.f32 1.0, %v1777_v56 }
 0x4bb   : > { %v797_v61 = vmul.f32 %v795_v59, %v789_v58  ;;  %v957_v58 = vld [vmem:[#allocation5] sm:$0xf]  ;;  %v1753_v59 = vld [vmem:[#allocation11] sm:$0xff]  }
 0x4bd   : > { %v799_v62 = vpack.c.bf16 %v797_v61, %v796_v60 }
 0x4bf   : > { %1566 = vmatmul.mubr.bf16.vlgmr.msra.gmra.mxu0 %v799_v62 }
 0x4c0   : > { %1591 = vmatprep.mubr.msk.bf16.mxu0 %vm2066_vm0, %v2065_v0  ;;  %1576 = vmatpush3.bf16.msra.mxu0 %v1746_v22  ;;  %v1758_v22 = vld [vmem:[#allocation13 + $0x18] sm:$0xff]  }
 0x4c1   : > { %1577 = vmatprep.subr.bf16.mxu0 %v2065_v0 }
 0x4c4   : > { %1578 = vmatpush3.bf16.msra.mxu0 %v1747_v23  ;;  %v1759_v23 = vld [vmem:[#allocation13 + $0x10] sm:$0xff]  }
 0x4c5   : > { %1579 = vmatprep.subr.bf16.mxu0 %v2065_v0 }
 0x4c8   : > { %1580 = vmatpush3.bf16.msra.mxu0 %v1748_v24  ;;  %v1760_v24 = vld [vmem:[#allocation13 + $0x8] sm:$0xff]  }
 0x4c9   : > { %1581 = vmatprep.subr.bf16.mxu0 %v2065_v0 }
 0x4cc   : > { %1582 = vmatpush3.bf16.msra.mxu0 %v1749_v25  ;;  %v1761_v25 = vld [vmem:[#allocation13] sm:$0xff]  }
 0x4cd   : > { %1583 = vmatprep.subr.bf16.mxu0 %v2065_v0 }
 0x4d0   : > { %1584 = vmatpush3.bf16.msra.mxu0 %v1750_v26 }
 0x4d1   : > { %1585 = vmatprep.subr.bf16.mxu0 %v2065_v0 }
 0x4d4   : > { %1586 = vmatpush3.bf16.msra.mxu0 %v1751_v27 }
 0x4d5   : > { %1587 = vmatprep.subr.bf16.mxu0 %v2065_v0 }
 0x4d8   : > { %1588 = vmatpush3.bf16.msra.mxu0 %v1752_v28 }
 0x4d9   : > { %1589 = vmatprep.subr.bf16.mxu0 %v2065_v0 }
 0x4dc   : > { %1590 = vmatpush3.bf16.msra.mxu0 %v1753_v59 }
 0x57f   : > { %v902_v2 = vpop.f32.mrf.mxu0 }
 0x580   : > { %v903_v3 = vadd.f32 %v902_v2, %v819_v1 }
 0x581   : > { %v1567_v4 = vpop.f32.mrf.mxu0 }
 0x582   : > { %v909_v5 = vsel %vm590_vm2, %v903_v3, 0.0 }
 0x583   : > { %911 = vadd.xlane.f32.xlu0 %v909_v5  ;;  %v905_v6 = vpop.f32.mrf.mxu0 }
 0x584   : > { %v906_v7 = vadd.f32 %v905_v6, %v819_v1 }
 0x585   : > { %v1568_v9 = vpop.f32.mrf.mxu0 }
 0x586   : > { %v910_v11 = vsel %vm590_vm2, %v906_v7, 0.0 }
 0x587   : > { %913 = vadd.xlane.f32.xlu1 %v910_v11 }
 0x60c   : > { %v912_v12 = vpop.xlane.xlu0 %911 }
 0x60d   : > { %v915_v13 = vmul.f32 0.015625, %v912_v12 }
 0x60f   : > { %v917_v14 = vsub.f32 %v903_v3, %v915_v13  ;;  %v1004_v3 = vld [vmem:[%s2503_s9] sm:$0x7] }
 0x610   : > { %v914_v15 = vpop.xlane.xlu1 %913  ;;  %v1025_v4 = vrot.slane %v1004_v3, %v2353_v8 }
 0x611   : > { %v916_v16 = vmul.f32 0.015625, %v914_v15  ;;  %v919_v17 = vsel %vm590_vm2, %v917_v14, 0.0 }
 0x612   : > { %v921_v18 = vmul.f32 %v919_v17, %v919_v17 }
 0x613   : > { %v918_v19 = vsub.f32 %v906_v7, %v916_v16 }
 0x614   : > { %923 = vadd.xlane.f32.xlu0 %v921_v18  ;;  %v1754_v18 = vld [vmem:[#allocation13 + $0x38] sm:$0xff]  }
 0x615   : > { %v920_v20 = vsel %vm590_vm2, %v918_v19, 0.0  ;;  %v1755_v19 = vld [vmem:[#allocation13 + $0x30] sm:$0xff]  }
 0x616   : > { %v922_v21 = vmul.f32 %v920_v20, %v920_v20 }
 0x618   : > { %925 = vadd.xlane.f32.xlu1 %v922_v21  ;;  %v1757_v21 = vld [vmem:[#allocation13 + $0x20] sm:$0xff]  }
 0x69d   : > { %v924_v29 = vpop.xlane.xlu0 %923 }
 0x69e   : > { %v927_v30 = vmul.f32 0.015625, %v924_v29  ;;  %v1131_v29 = vrot.slane %v1004_v3, %v2378_v44 }
 0x6a0   : > { %v929_v31 = vadd.f32 1e-05, %v927_v30 }
 0x6a1   : > { %v926_v32 = vpop.xlane.xlu1 %925 }
 0x6a2   : > { %1778 = vrsqrt.f32 %v929_v31  ;;  %v928_v33 = vmul.f32 0.015625, %v926_v32  ;;  %v1136_v31 = vrot.slane %v1004_v3, %v2380_v45 }
 0x6a4   : > { %v930_v34 = vadd.f32 1e-05, %v928_v33 }
 0x6a6   : > { %1780 = vrsqrt.f32 %v930_v34 }
 0x6af   : > { %v1779_v36 = vpop.eup %1778 }
 0x6b0   : > { %v933_v38 = vmul.f32 %v1779_v36, %v919_v17 }
 0x6b2   : > { %v939_v39 = vmul.f32 %v938_v35, %v933_v38 }
 0x6b3   : > { %v1781_v40 = vpop.eup %1780 }
 0x6b4   : > { %v934_v41 = vmul.f32 %v1781_v40, %v920_v20  ;;  %v945_v42 = vadd.f32 %v944_v37, %v939_v39  ;;  %v1756_v20 = vld [vmem:[#allocation13 + $0x28] sm:$0xff]  }
 0x6b5   : > { %v1143_v40 = vld [vmem:[%s2505_s11] sm:$0x7] }
 0x6b6   : > { %v940_v43 = vmul.f32 %v938_v35, %v934_v41  ;;  %v949_v46 = vmul.f32 0.70710677, %v945_v42  ;;  %v947_v52 = vmul.f32 0.5, %v945_v42  ;;  %v1164_v41 = vrot.slane %v1143_v40, %v2353_v8 }
 0x6b7   : > { %v1274_v59 = vrot.slane %v1143_v40, %v2380_v45 }
 0x6b8   : > { %v946_v47 = vadd.f32 %v944_v37, %v940_v43  ;;  %1782 = verf.f32 %v949_v46 }
 0x6ba   : > { %v950_v48 = vmul.f32 0.70710677, %v946_v47  ;;  %v948_v53 = vmul.f32 0.5, %v946_v47 }
 0x6bc   : > { %1784 = verf.f32 %v950_v48 }
 0x6c5   : > { %v1783_v49 = vpop.eup %1782 }
 0x6c6   : > { %v953_v50 = vadd.f32 1.0, %v1783_v49 }
 0x6c8   : > { %v955_v55 = vmul.f32 %v953_v50, %v947_v52 }
 0x6c9   : > { %v1785_v51 = vpop.eup %1784 }
 0x6ca   : > { %v954_v54 = vadd.f32 1.0, %v1785_v51 }
 0x6cc   : > { %v956_v56 = vmul.f32 %v954_v54, %v948_v53 }
 0x6ce   : > { %v958_v57 = vpack.c.bf16 %v956_v56, %v955_v55 }
 0x6d0   : > { %1570 = vmatpush3.bf16.msra.mxu1 %v958_v57  ;;  %v1269_v57 = vrot.slane %v1143_v40, %v2378_v44 }
 0x6d1   : > { %1595 = vmatprep.subr.bf16.mxu1 %v2065_v0 }
 0x6d3   : > { %1572 = vmatmul.mubr.msk.bf16.vlgmr.msra.gmra.mxu1 %vm959_vm3, %v957_v58 }
 0x6d4   : > { %1611 = vmatprep.mubr.msk.bf16.mxu1 %vm2066_vm0, %v2065_v0  ;;  %1596 = vmatpush3.bf16.msra.mxu1 %v1754_v18 }
 0x6d5   : > { %1597 = vmatprep.subr.bf16.mxu1 %v2065_v0 }
 0x6d8   : > { %1598 = vmatpush3.bf16.msra.mxu1 %v1755_v19 }
 0x6d9   : > { %1599 = vmatprep.subr.bf16.mxu1 %v2065_v0 }
 0x6dc   : > { %1600 = vmatpush3.bf16.msra.mxu1 %v1756_v20 }
 0x6dd   : > { %1601 = vmatprep.subr.bf16.mxu1 %v2065_v0 }
 0x6e0   : > { %1602 = vmatpush3.bf16.msra.mxu1 %v1757_v21 }
 0x6e1   : > { %1603 = vmatprep.subr.bf16.mxu1 %v2065_v0 }
 0x6e4   : > { %1604 = vmatpush3.bf16.msra.mxu1 %v1758_v22 }
 0x6e5   : > { %1605 = vmatprep.subr.bf16.mxu1 %v2065_v0 }
 0x6e8   : > { %1606 = vmatpush3.bf16.msra.mxu1 %v1759_v23 }
 0x6e9   : > { %1607 = vmatprep.subr.bf16.mxu1 %v2065_v0 }
 0x6ec   : > { %1608 = vmatpush3.bf16.msra.mxu1 %v1760_v24 }
 0x6ed   : > { %1609 = vmatprep.subr.bf16.mxu1 %v2065_v0 }
 0x6f0   : > { %1610 = vmatpush3.bf16.msra.mxu1 %v1761_v25 }
 0x793   : > { %v997_v60 = vpop.f32.mrf.mxu1 }
 0x794   : > { %v1003_v61 = vmul.f32 0.5, %v997_v60 }
 0x795   : > { %v1573_v62 = vpop.f32.mrf.mxu1 }
 0x796   : > { %v1005_v63 = vpack.c.bf16 %v1003_v61, %v1003_v61 }
 0x797   : > { %v1000_v1 = vpop.f32.mrf.mxu1 }
 0x798   : > { %1592 = vmatmul.mubr.bf16.vlgmr.msra.gmra.mxu0 %v1005_v63 }
 0x799   : > { %v1574_v2 = vpop.f32.mrf.mxu1 }
 0x858   : > { %v1108_v5 = vpop.f32.mrf.mxu0 }
 0x859   : > { %v1109_v6 = vadd.f32 %v1108_v5, %v1025_v4 }
 0x85a   : > { %v1593_v7 = vpop.f32.mrf.mxu0 }
 0x85b   : > { %v1115_v9 = vsel %vm1114_vm4, %v1109_v6, 0.0 }
 0x85c   : > { %1116 = vadd.xlane.f32.xlu0 %v1115_v9  ;;  %v1111_v11 = vpop.f32.mrf.mxu0 }
 0x85e   : > { %v1594_v12 = vpop.f32.mrf.mxu0 }
 0x8e5   : > { %v1117_v13 = vpop.xlane.xlu0 %1116 }
 0x8e6   : > { %v1118_v14 = vmul.f32 0.03125, %v1117_v13 }
 0x8e8   : > { %v1119_v15 = vsub.f32 %v1109_v6, %v1118_v14 }
 0x8ea   : > { %v1120_v16 = vsel %vm1114_vm4, %v1119_v15, 0.0 }
 0x8eb   : > { %v1121_v17 = vmul.f32 %v1120_v16, %v1120_v16 }
 0x8ed   : > { %1122 = vadd.xlane.f32.xlu1 %v1121_v17 }
 0x976   : > { %v1123_v26 = vpop.xlane.xlu1 %1122 }
 0x977   : > { %v1124_v27 = vmul.f32 0.03125, %v1123_v26 }
 0x979   : > { %v1125_v28 = vadd.f32 1e-05, %v1124_v27 }
 0x97b   : > { %1786 = vrsqrt.f32 %v1125_v28 }
 0x988   : > { %v1787_v30 = vpop.eup %1786 }
 0x989   : > { %v1127_v32 = vmul.f32 %v1787_v30, %v1120_v16 }
 0x98b   : > { %v1132_v33 = vmul.f32 %v1131_v29, %v1127_v32 }
 0x98d   : > { %v1137_v34 = vadd.f32 %v1136_v31, %v1132_v33 }
 0x98f   : > { %v1139_v35 = vmul.f32 0.70710677, %v1137_v34  ;;  %v1138_v37 = vmul.f32 0.5, %v1137_v34 }
 0x991   : > { %1788 = verf.f32 %v1139_v35 }
 0x99e   : > { %v1789_v36 = vpop.eup %1788 }
 0x99f   : > { %v1141_v38 = vadd.f32 1.0, %v1789_v36 }
 0x9a1   : > { %v1142_v39 = vmul.f32 %v1141_v38, %v1138_v37 }
 0x9a3   : > { %v1144_v0 = vpack.c.bf16 %v1142_v39, %v1142_v39 }
 0x9a5   : > { %1612 = vmatmul.mubr.bf16.vlgmr.msra.gmra.mxu1 %v1144_v0 }
 0xa65   : > { %v1247_v42 = vpop.f32.mrf.mxu1 }
 0xa66   : > { %v1248_v43 = vadd.f32 %v1247_v42, %v1164_v41 }
 0xa67   : > { %v1613_v46 = vpop.f32.mrf.mxu1 }
 0xa68   : > { %v1253_v47 = vsel %vm590_vm2, %v1248_v43, 0.0 }
 0xa69   : > { %1254 = vadd.xlane.f32.xlu0 %v1253_v47  ;;  %v1250_v48 = vpop.f32.mrf.mxu1 }
 0xa6b   : > { %v1614_v49 = vpop.f32.mrf.mxu1 }
 0xaf2   : > { %v1255_v50 = vpop.xlane.xlu0 %1254 }
 0xaf3   : > { %v1256_v51 = vmul.f32 0.015625, %v1255_v50 }
 0xaf5   : > { %v1257_v52 = vsub.f32 %v1248_v43, %v1256_v51 }
 0xaf7   : > { %v1258_v53 = vsel %vm590_vm2, %v1257_v52, 0.0 }
 0xaf8   : > { %v1259_v54 = vmul.f32 %v1258_v53, %v1258_v53 }
 0xafa   : > { %1260 = vadd.xlane.f32.xlu1 %v1259_v54 }
 0xb83   : > { %v1261_v8 = vpop.xlane.xlu1 %1260 }
 0xb84   : > { %v1262_v55 = vmul.f32 0.015625, %v1261_v8 }
 0xb86   : > { %v1263_v56 = vadd.f32 1e-05, %v1262_v55 }
 0xb88   : > { %1790 = vrsqrt.f32 %v1263_v56 }
 0xb95   : > { %v1791_v58 = vpop.eup %1790 }
 0xb96   : > { %v1265_v60 = vmul.f32 %v1791_v58, %v1258_v53 }
 0xb98   : > { %v1270_v10 = vmul.f32 %v1269_v57, %v1265_v60 }
 0xb9a   : > { %v1275_v61 = vadd.f32 %v1274_v59, %v1270_v10 }
 0xb9c   : > { %1276 = vst [vmem:[%s516_s30] sm:$0xff] %v1275_v61 }
 0xb9d   : > { %1989 = shalt.err (!%p1986_p3)
}
 0xb9e   : > { %s1990_s29 = scalar_lea.hbm %s1289_s4, 128  ;;  %s1994_s8 = scalar_lea.hbm %s2506_s12, 256 }
 0xb9f   : > { %p1991_p4 = scmp.ne.s32.totalorder %s1289_s4, %s1990_s29  ;;  %p1995_p0 = scmp.lt.s32.totalorder %s1289_s4, %s2506_s12 }
 0xba0   : > { %p1996_p7 = scmp.lt.s32.totalorder %s1994_s8, %s1990_s29 }
 0xba1   : > { %p1992_p6 = pnand %p1991_p4, %p2539_p8 }
 0xba2   : > { %p1997_p2 = por %p1996_p7, %p1995_p0 }
 0xba3   : > { %p1993_p12 = pneg %p1992_p6 }
 0xba5   : > { %p1998_p9 = pnand %p1997_p2, %p1993_p12 }
 0xba7   : > { %2001 = shalt.err (!%p1998_p9)
}
 0xba8   : > { %1641 = dma.vmem_to_hbm [thread:$0]  (%p2539_p8), %s1292_s13, 128, %s1289_s4, %s1278_s6  }
 0xba9 PF: > { %s1303_s30 = sand.u32 1, %s2040_s21   ;;  %p2540_p11 = scmp.ne.s32.totalorder %s2529_s15, 0 }
 0xbaa   : > { %p2541_p10 = scmp.ge.s32.totalorder %s2052_s24, 2  ;;  %s1304_s1 = scalar_lea.sflag [#allocation4], %s1303_s30 }
 0xbac   : > { %p1667_p13 = pnand %p2541_p10, %p2540_p11 }
 0xbae   : > { %p1668_p5 = pneg %p1667_p13 }
 0xbb0   : > { %2035 = dma.done.wait (%p1668_p5), %s1304_s1, 128  }
 0xbb1   : > { %2037 = vsyncadd (%p1668_p5), %s1304_s1, 4294967168  ;;  %p28_p1 = scmp.ge.s32.totalorder %s2251_s16, 4   ;;  %s2542_s21 = smov %s2044_s22 }
 0xbb2   : > { %s2543_s22 = smov %s2048_s23  ;;  %s2544_s23 = smov %s2262_s26 }
 0xbb3   : > { %s2545_s24 = smov %s2251_s16  ;;  %30 = sbr.rel (!%p28_p1) target bundleno = 15 (0xf), region = 137 }
 0xbb8   :  { %1309 = vsyncpa [#allocation3], 1 }
 0xbb9   :  { %1311 = vsyncpa [#allocation3 + $0x1], 1 }
 0xbba   :  { %1312 = vsyncpa [#allocation6], 1 }
 0xbbb   :  { %1313 = vsyncpa [#allocation9], 1 }
 0xbbc   :  { %1314 = vsyncpa [#allocation12], 1 }
 0xbbd   :  { %1315 = vsyncpa [#allocation4], 1 }
 0xbbe   :  { %1317 = vsyncpa [#allocation4 + $0x1], 1 }

// kernel: tpu_custom_call.1
= control target key start
LH: loop header
LB: loop body
LE: loop exit
PB: predicated region body
PF: predicated region fallthrough
CT: control target
= control target key end

     0   :  { %s2494_s0 = inlined_call_operand.hbm [shape: f32[32,32], index: 0, kind: input, shape index: {}]   ;;  %s2495_s1 = inlined_call_operand.hbm [shape: bf16[8,16], index: 1, kind: input, shape index: {}]   ;;  %s2496_s2 = inlined_call_operand.hbm [shape: bf16[32,128], index: 2, kind: input, shape index: {}]   ;;  %s2497_s3 = inlined_call_operand.vmem [shape: f32[3,128], index: 3, kind: input, shape index: {}]   ;;  %s2498_s4 = inlined_call_operand.hbm [shape: bf16[128,128], index: 4, kind: input, shape index: {}]   ;;  %s2499_s5 = inlined_call_operand.vmem [shape: f32[3,128], index: 5, kind: input, shape index: {}]   ;;  %s2500_s6 = inlined_call_operand.hbm [shape: bf16[128,128], index: 6, kind: input, shape index: {}]   ;;  %s2501_s7 = inlined_call_operand.vmem [shape: f32[3,128], index: 7, kind: input, shape index: {}]   ;;  %s2502_s8 = inlined_call_operand.hbm [shape: bf16[128,128], index: 8, kind: input, shape index: {}]   ;;  %s2503_s9 = inlined_call_operand.vmem [shape: f32[3,128], index: 9, kind: input, shape index: {}]   ;;  %s2504_s10 = inlined_call_operand.hbm [shape: bf16[128,128], index: 10, kind: input, shape index: {}]   ;;  %s2505_s11 = inlined_call_operand.vmem [shape: f32[3,128], index: 11, kind: input, shape index: {}]   ;;  %s2506_s12 = inlined_call_operand.hbm [shape: f32[16,128], index: 12, kind: output, shape index: {}]  }
   0x1   :  { %2511 = sst [smem:[#allocation20_spill]] %s2495_s1 }
   0x2   :  { %2512 = sst [smem:[#allocation21_spill]] %s2496_s2 }
   0x3   :  { %2513 = sst [smem:[#allocation22_spill]] %s2498_s4 }
   0x4   :  { %2514 = sst [smem:[#allocation23_spill]] %s2500_s6 }
   0x5   :  { %2515 = sst [smem:[#allocation24_spill]] %s2502_s8 }
   0x6   :  { %2516 = sst [smem:[#allocation25_spill]] %s2504_s10 }
   0x7   :  { %17 = vsyncpa [#allocation3], 0 }
   0x8   :  { %19 = vsyncpa [#allocation3 + $0x1], 0 }
   0x9   :  { %20 = vsyncpa [#allocation6], 0 }
   0xa   :  { %21 = vsyncpa [#allocation9], 0 }
   0xb   :  { %22 = vsyncpa [#allocation12], 0 }
   0xc   :  { %23 = vsyncpa [#allocation4], 0 }
   0xd   :  { %25 = vsyncpa [#allocation4 + $0x1], 0  ;;  %s2133_s21 = smov 0   ;;  %s2135_s22 = smov 0  }
   0xe   :  { %s2137_s23 = smov 0   ;;  %s2139_s24 = smov 0  }
   0xf LB: > { %s2054_s25 = smov [#allocation5]   ;;  %s2154_s27 = sadd.s32 4294967295, %s2052_s24   ;;  %s2052_s24 = sphi %s2139_s24, %s2545_s24   ;;  %s2048_s23 = sphi %s2137_s23, %s2544_s23   ;;  %s2044_s22 = sphi %s2135_s22, %s2543_s22   ;;  %s2040_s21 = sphi %s2133_s21, %s2542_s21  }
  0x10   : > { %s332_s26 = sshll.u32 %s2054_s25, 4  ;;  %p1419_p0 = scmp.ge.s32.totalorder %s2052_s24, 1  ;;  %s333_s26 = int_to_ptr.vmem [resolvable:$true] %s332_s26 }
  0x11   : > { %p2507_p1 = scmp.eq.s32.totalorder %s2154_s27, 0  ;;  %p319_p2 = scmp.lt.s32.totalorder %s2052_s24, 3 }
  0x12   : > { %s2055_s29 = smov [#allocation8]   ;;  %s2056_s14 = smov [#allocation11]  }
  0x13   : > { %p2159_p3 = pnand %p1419_p0, %p319_p2  ;;  %s358_s30 = sshll.u32 %s2055_s29, 4  ;;  %s2172_s30 = int_to_ptr.vmem [resolvable:$true] %s358_s30 }
  0x14   : > { %s390_s15 = sshll.u32 %s2056_s14, 4  ;;  %s1803_s17 = scalar_lea.vmem %s333_s26, 64  ;;  %s2174_s15 = int_to_ptr.vmem [resolvable:$true] %s390_s15 }
  0x15   : > { %s2517_s28 = scalar_select %p2159_p3, 1, 0 }
  0x16   : > { %p1643_p5 = pneg %p2159_p3  ;;  %p1804_p8 = scmp.ne.s32.totalorder %s333_s26, %s1803_s17 }
  0x17   : > { %p1811_p11 = scmp.lt.s32.totalorder %s333_s26, %s333_s26  ;;  %p1812_p12 = scmp.lt.s32.totalorder %s1803_s17, %s1803_s17 }
  0x18   : > { %p2168_p6 = pnand %p1643_p5, %p2507_p1 }
  0x19   : > { %p1813_p13 = por %p1812_p12, %p1811_p11 }
  0x1a   : > { %p2178_p7 = pneg %p2168_p6 }
  0x1c   : > { %p1806_p9 = pnand %p1804_p8, %p2178_p7 }
  0x1e   : > { %p1807_p10 = pneg %p1806_p9 }
  0x20   : > { %p1814_p0 = pnand %p1813_p13, %p1807_p10 }
  0x22   : > { %1817 = shalt.err (!%p1814_p0)
}
  0x23   : > { %s2520_s1 = sld [smem:[#allocation20_spill]]  ;;  %s1829_s20 = scalar_lea.vmem %s2172_s30, 1024 }
  0x24   : > { %p1830_p2 = scmp.ne.s32.totalorder %s2172_s30, %s1829_s20  ;;  %p1837_p9 = scmp.lt.s32.totalorder %s2172_s30, %s2172_s30 }
  0x25   : > { %p1838_p11 = scmp.lt.s32.totalorder %s1829_s20, %s1829_s20 }
  0x26   : > { %p1832_p5 = pnand %p1830_p2, %p2178_p7 }
  0x27   : > { %p1839_p10 = por %p1838_p11, %p1837_p9 }
  0x28   : > { %p1833_p8 = pneg %p1832_p5 }
  0x29   : > { %1646 = dma.hbm_to_vmem [thread:$0]  (!%p2168_p6), %s2520_s1, 64, %s333_s26, [#allocation6]  }
  0x2a   : > { %p1840_p12 = pnand %p1839_p10, %p1833_p8 }
  0x2c   : > { %1843 = shalt.err (!%p1840_p12)
}
  0x2d   : > { %s2057_s25 = smov 64   ;;  %s2058_s29 = smov 4  }
  0x2e   : > { %s2521_s4 = sld [smem:[#allocation22_spill]]  ;;  %s1855_s17 = scalar_lea.vmem %s2174_s15, 1024 }
  0x2f   : > { %p1856_p13 = scmp.ne.s32.totalorder %s2174_s15, %s1855_s17  ;;  %p1863_p5 = scmp.lt.s32.totalorder %s2174_s15, %s2174_s15 }
  0x30   : > { %p1864_p8 = scmp.lt.s32.totalorder %s1855_s17, %s1855_s17 }
  0x31   : > { %p1858_p0 = pnand %p1856_p13, %p2178_p7 }
  0x32   : > { %p1865_p9 = por %p1864_p8, %p1863_p5 }
  0x33   : > { %p1859_p2 = pneg %p1858_p0 }
  0x34   : > { %1652 = dma.hbm_to_vmem [thread:$0]  (!%p2168_p6), %s2521_s4, 1024, %s2172_s30, [#allocation9], %s2057_s25, %s2057_s25, %s2058_s29  }
  0x35   : > { %p1866_p11 = pnand %p1865_p9, %p1859_p2 }
  0x37   : > { %1869 = shalt.err (!%p1866_p11)
}
  0x38   : > { %s2522_s8 = sld [smem:[#allocation24_spill]]  ;;  %s2059_s30 = smov [#allocation7]  }
  0x39   : > { %s342_s20 = sshll.u32 %s2059_s30, 4  ;;  %s2060_s26 = smov [#allocation10]   ;;  %s343_s20 = int_to_ptr.vmem [resolvable:$true] %s342_s20 }
  0x3a   : > { %s374_s14 = sshll.u32 %s2060_s26, 4  ;;  %s1881_s17 = scalar_lea.vmem %s343_s20, 256  ;;  %s375_s14 = int_to_ptr.vmem [resolvable:$true] %s374_s14 }
  0x3b   : > { %p1882_p10 = scmp.ne.s32.totalorder %s343_s20, %s1881_s17  ;;  %p1889_p0 = scmp.lt.s32.totalorder %s343_s20, %s343_s20 }
  0x3c   : > { %p1890_p2 = scmp.lt.s32.totalorder %s1881_s17, %s1881_s17 }
  0x3d   : > { %p1884_p12 = pnand %p1882_p10, %p2178_p7 }
  0x3e   : > { %1658 = dma.hbm_to_vmem [thread:$0]  (!%p2168_p6), %s2522_s8, 1024, %s2174_s15, [#allocation12], %s2057_s25, %s2057_s25, %s2058_s29  }
  0x3f   : > { %p1885_p13 = pneg %p1884_p12  ;;  %p1891_p5 = por %p1890_p2, %p1889_p0 }
  0x41   : > { %p1892_p8 = pnand %p1891_p5, %p1885_p13 }
  0x43   : > { %1895 = shalt.err (!%p1892_p8)
}
  0x44   : > { %s2523_s2 = sld [smem:[#allocation21_spill]]  ;;  %s1907_s19 = scalar_lea.vmem %s375_s14, 1024 }
  0x45   : > { %p1908_p9 = scmp.ne.s32.totalorder %s375_s14, %s1907_s19  ;;  %p1915_p12 = scmp.lt.s32.totalorder %s375_s14, %s375_s14 }
  0x46   : > { %p1916_p0 = scmp.lt.s32.totalorder %s1907_s19, %s1907_s19 }
  0x47   : > { %p1910_p11 = pnand %p1908_p9, %p2178_p7 }
  0x48   : > { %p1917_p13 = por %p1916_p0, %p1915_p12 }
  0x49   : > { %p1911_p10 = pneg %p1910_p11 }
  0x4a   : > { %1649 = dma.hbm_to_vmem [thread:$0]  (!%p2168_p6), %s2523_s2, 256, %s343_s20, [#allocation6], %s2057_s25, %s2057_s25, %s2058_s29  }
  0x4b   : > { %p1918_p2 = pnand %p1917_p13, %p1911_p10 }
  0x4d   : > { %1921 = shalt.err (!%p1918_p2)
}
  0x4e   : > { %s2524_s6 = sld [smem:[#allocation23_spill]]  ;;  %s2061_s20 = smov [#allocation13]  }
  0x4f   : > { %s406_s17 = sshll.u32 %s2061_s20, 4  ;;  %s407_s17 = int_to_ptr.vmem [resolvable:$true] %s406_s17 }
  0x50   : > { %s1933_s15 = scalar_lea.vmem %s407_s17, 1024  ;;  %p1941_p11 = scmp.lt.s32.totalorder %s407_s17, %s407_s17 }
  0x51   : > { %p1934_p5 = scmp.ne.s32.totalorder %s407_s17, %s1933_s15  ;;  %p1942_p10 = scmp.lt.s32.totalorder %s1933_s15, %s1933_s15 }
  0x53   : > { %p1936_p8 = pnand %p1934_p5, %p2178_p7  ;;  %p1943_p12 = por %p1942_p10, %p1941_p11 }
  0x54   : > { %1655 = dma.hbm_to_vmem [thread:$0]  (!%p2168_p6), %s2524_s6, 1024, %s375_s14, [#allocation9], %s2057_s25, %s2057_s25, %s2058_s29  }
  0x55   : > { %p1937_p9 = pneg %p1936_p8 }
  0x57   : > { %p1944_p0 = pnand %p1943_p12, %p1937_p9 }
  0x59   : > { %1947 = shalt.err (!%p1944_p0)
}
  0x5a   : > { %s2525_s10 = sld [smem:[#allocation25_spill]]  ;;  %s1418_s13 = sadd.s32 4294967294, %s2052_s24  }
  0x5b   : > { %s2251_s16 = sadd.s32 1, %s2052_s24   ;;  %s38_s30 = sadd.s32 1, %s2048_s23 }
  0x5c   : > { %s35_s19 = ssub.s32 %s2052_s24, %s2251_s16  ;;  %p45_p13 = scmp.ne.s32.totalorder %s2048_s23, %s2044_s22 }
  0x5d   : > { %p36_p7 = scmp.eq.s32.totalorder %s35_s19, 0  ;;  %p46_p2 = scmp.eq.s32.totalorder %s2052_s24, 0 }
  0x5e   : > { %p51_p5 = scmp.ne.s32.totalorder %s2044_s22, %s2040_s21  ;;  %p306_p9 = scmp.eq.s32.totalorder %s2154_s27, 1 }
  0x5f   : > { %s2262_s26 = scalar_select %p36_p7, %s2048_s23, %s38_s30  }
  0x60   : > { %1661 = dma.hbm_to_vmem [thread:$0]  (!%p2168_p6), %s2525_s10, 1024, %s407_s17, [#allocation12], %s2057_s25, %s2057_s25, %s2058_s29  }
  0x61   : > { %p2264_p8 = por %p46_p2, %p45_p13  ;;  %p2270_p6 = por %p2507_p1, %p51_p5 }
  0x62   : > { %p312_p11 = scmp.eq.s32.totalorder %s1418_s13, 1  ;;  %p1676_p10 = scmp.lt.s32.totalorder %s2052_s24, 2 }
  0x63   : > { %s2527_s25 = scalar_select %p2270_p6, 1, 0 }
  0x64   : > { %s423_s29 = sand.u32 1, %s2048_s23   ;;  %p2277_p12 = por %p306_p9, %p45_p13 }
  0x65   : > { %p2281_p0 = por %p312_p11, %p51_p5  ;;  %s1427_s18 = sshll.u32 %s423_s29, 4 }
  0x66   : > { %s2528_s17 = scalar_select %p2277_p12, 1, 0 }
  0x67   : > { %s2529_s15 = scalar_select %p2281_p0, 1, 0 }
  0x68   : > { %s1479_s14 = sshll.u32 %s2052_s24, 8  ;;  %s427_s13 = scalar_lea.vmem [#allocation2], %s1427_s18 }
  0x69   : > { %s2289_s1 = scalar_lea.hbm %s2494_s0, %s1479_s14  ;;  %s434_s2 = sshll.u32 %s427_s13, 4  ;;  %s2291_s2 = int_to_ptr.vmem [resolvable:$true] %s434_s2 }
  0x6a   : > { %p2295_p7 = pnand %p1676_p10, %p2264_p8  ;;  %s2299_s6 = scalar_lea.sflag [#allocation3], %s423_s29 }
  0x6b   : > { %s1948_s8 = scalar_lea.hbm %s2289_s1, 256  ;;  %s1953_s18 = scalar_lea.hbm %s2494_s0, 512 }
  0x6c   : > { %p1949_p13 = scmp.ne.s32.totalorder %s2289_s1, %s1948_s8  ;;  %p1950_p2 = pneg %p2295_p7 }
  0x6d   : > { %p1954_p8 = scmp.lt.s32.totalorder %s2289_s1, %s2494_s0  ;;  %p1955_p11 = scmp.lt.s32.totalorder %s1953_s18, %s1948_s8 }
  0x6e   : > { %p1951_p5 = pnand %p1950_p2, %p1949_p13 }
  0x6f   : > { %p1956_p10 = por %p1955_p11, %p1954_p8 }
  0x70   : > { %p1952_p9 = pneg %p1951_p5 }
  0x72   : > { %p1957_p4 = pnand %p1956_p10, %p1952_p9 }
  0x74   : > { %1960 = shalt.err (!%p1957_p4)
}
  0x75   : > { %s1961_s20 = scalar_lea.vmem %s2291_s2, 256  ;;  %s2062_s29 = smov [#allocation2]  }
  0x76   : > { %p1962_p1 = scmp.ne.s32.totalorder %s2291_s2, %s1961_s20  ;;  %s1966_s10 = sshll.u32 %s2062_s29, 4  ;;  %s1967_s10 = int_to_ptr.vmem [resolvable:$false] %s1966_s10 }
  0x77   : > { %s1968_s14 = scalar_lea.vmem %s1967_s10, 512  ;;  %p1969_p5 = scmp.lt.s32.totalorder %s2291_s2, %s1967_s10 }
  0x78   : > { %p1964_p0 = pnand %p1962_p1, %p1950_p2  ;;  %p1970_p12 = scmp.lt.s32.totalorder %s1968_s14, %s1961_s20 }
  0x7a   : > { %p1965_p13 = pneg %p1964_p0  ;;  %p1971_p6 = por %p1970_p12, %p1969_p5 }
  0x7c   : > { %p1972_p3 = pnand %p1971_p6, %p1965_p13 }
  0x7e   : > { %1975 = shalt.err (!%p1972_p3)
}
  0x7f   : > { %s2063_s8 = smov 128   ;;  %s2064_s19 = smov 8  }
  0x80   : > { %1665 = dma.hbm_to_vmem [thread:$0]  (!%p2295_p7), %s2289_s1, 256, %s2291_s2, %s2299_s6, %s2063_s8, %s2063_s8, %s2064_s19  }
  0x81   : > { %p2531_p1 = scmp.ne.s32.totalorder %s2517_s28, 0 }
  0x82   : > { %s2323_s18 = sand.u32 (!%p2531_p1), 1, %s2044_s22   ;;  %p2532_p3 = scmp.ne.s32.totalorder (!%p2531_p1), %s2527_s25, 0 }
  0x83   : > { %446 = sbr.rel (%p2531_p1) target bundleno = 2985 (0xba9), region = 68  ;;  %s1431_s10 = sshll.u32 (!%p2531_p1), %s2323_s18, 4 }
  0x84   : > { %s449_s30 = scalar_lea.sflag (!%p2531_p1), [#allocation3], %s2323_s18  ;;  %s452_s13 = scalar_lea.vmem (!%p2531_p1), [#allocation2], %s1431_s10 }
  0x88   : > { %2019 = dma.done.wait (%p2532_p3), %s449_s30, 256  }
  0x89   : > { %2021 = vsyncadd (%p2532_p3), %s449_s30, 4294967040  ;;  %p2533_p4 = scmp.eq.s32.totalorder %s2154_s27, 0 }
  0x8b   : > { %2023 = dma.done.wait (%p2533_p4), [#allocation6], 320   ;;  %p2534_p6 = pmov %p2533_p4 }
  0x8c   : > { %p2535_p12 = pmov %p2533_p4 }
  0x8d   : > { %2025 = vsyncadd (%p2534_p6), [#allocation6], 4294966976 }
  0x8e   : > { %2027 = dma.done.wait (%p2535_p12), [#allocation9], 2048   ;;  %p2536_p0 = pmov %p2533_p4 }
  0x90   : > { %2029 = vsyncadd (%p2536_p0), [#allocation9], 4294965248  ;;  %p2537_p7 = pmov %p2536_p0 }
  0x91   : > { %p2538_p2 = pmov %p2536_p0 }
  0x92   : > { %2031 = dma.done.wait (%p2537_p7), [#allocation12], 2048  }
  0x93   : > { %2033 = vsyncadd (%p2538_p2), [#allocation12], 4294965248  ;;  %v2065_v0 = vmov 0.0   ;;  %vm2066_vm0 = vmmov 0   ;;  %v1728_v1 = vld [vmem:[#allocation7 + $0x8] sm:$0xff]   ;;  %v1729_v2 = vld [vmem:[#allocation7] sm:$0xff]   ;;  %v527_v6 = vlaneseq }
  0x94   : > { %1521 = vmatprep.subr.bf16.mxu0 %v2065_v0  ;;  %1525 = vmatprep.mubr.msk.bf16.mxu0 %vm2066_vm0, %v2065_v0  ;;  %v519_v3 = vld [vmem:[%s452_s13] sm:$0xff]  ;;  %v520_v4 = vld [vmem:[%s452_s13 + $0x8] sm:$0xff]  ;;  %vm543_vm1 = vcmask 261120   ;;  %vm959_vm3 = vcmask 130048   ;;  %s1438_s19 = sshll.u32 %s2323_s18, 3  ;;  %s1476_s10 = sshll.u32 %s2154_s27, 7 }
  0x95   : > { %1529 = vmatprep.subr.bf16.mxu1 %v2065_v0  ;;  %1545 = vmatprep.mubr.msk.bf16.mxu1 %vm2066_vm0, %v2065_v0  ;;  %v522_v5 = vpack.c.bf16 %v520_v4, %v519_v3  ;;  %v528_v7 = vshrl.u32 %v527_v6, 7  ;;  %v521_v9 = vld [vmem:[%s2497_s3] sm:$0x7]  ;;  %v2358_v10 = vand.u32 127, %v527_v6  ;;  %v1730_v30 = vld [vmem:[#allocation8 + $0x38] sm:$0xff]   ;;  %v1731_v31 = vld [vmem:[#allocation8 + $0x30] sm:$0xff]   ;;  %s1289_s4 = scalar_lea.hbm %s2506_s12, %s1476_s10 }
  0x96   : > { %1522 = vmatpush3.bf16.msra.mxu0 %v1728_v1  ;;  %1530 = vmatpush3.bf16.msra.mxu1 %v1730_v30  ;;  %v1732_v32 = vld [vmem:[#allocation8 + $0x28] sm:$0xff]   ;;  %v1733_v33 = vld [vmem:[#allocation8 + $0x20] sm:$0xff]   ;;  %v1734_v34 = vld [vmem:[#allocation8 + $0x18] sm:$0xff]   ;;  %s516_s30 = scalar_lea.vmem [#allocation14], %s1438_s19  ;;  %s1278_s6 = scalar_lea.sflag [#allocation4], %s2323_s18 }
  0x97   : > { %1523 = vmatprep.subr.bf16.mxu0 %v2065_v0  ;;  %v2353_v8 = vsub.s32 0, %v528_v7  ;;  %vm590_vm2 = vcmp.lt.s32.totalorder %v2358_v10, 64  ;;  %1531 = vmatprep.subr.bf16.mxu1 %v2065_v0  ;;  %v1735_v35 = vld [vmem:[#allocation8 + $0x10] sm:$0xff]   ;;  %v1736_v36 = vld [vmem:[#allocation8 + $0x8] sm:$0xff]   ;;  %v1737_v37 = vld [vmem:[#allocation8] sm:$0xff]   ;;  %v2378_v44 = vsub.s32 1, %v528_v7 }
  0x98   : > { %v2380_v45 = vsub.s32 2, %v528_v7  ;;  %v639_v4 = vld [vmem:[%s2499_s5] sm:$0x7]  ;;  %v1742_v30 = vld [vmem:[#allocation10 + $0x18] sm:$0xff]   ;;  %vm1114_vm4 = vcmp.lt.s32.totalorder %v2358_v10, 32  ;;  %s1291_s13 = sshll.u32 %s516_s30, 4  ;;  %s1292_s13 = int_to_ptr.vmem [resolvable:$true] %s1291_s13 }
  0x99   : > { %v530_v11 = vrot.slane %v521_v9, %v2353_v8  ;;  %v620_v46 = vrot.slane %v521_v9, %v2378_v44  ;;  %s1976_s28 = scalar_lea.vmem %s1292_s13, 128  ;;  %p2539_p8 = scmp.ne.s32.totalorder %s2528_s17, 0 }
  0x9a   : > { %1524 = vmatpush3.bf16.msra.mxu0 %v1729_v2  ;;  %1532 = vmatpush3.bf16.msra.mxu1 %v1731_v31  ;;  %v626_v48 = vrot.slane %v521_v9, %v2380_v45  ;;  %v1743_v31 = vld [vmem:[#allocation10 + $0x10] sm:$0xff]   ;;  %p1977_p9 = scmp.ne.s32.totalorder %s1292_s13, %s1976_s28  ;;  %s2067_s25 = smov [#allocation14]  }
  0x9b   : > { %1549 = vmatprep.subr.bf16.mxu0 %v2065_v0  ;;  %1533 = vmatprep.subr.bf16.mxu1 %v2065_v0  ;;  %s1980_s20 = sshll.u32 %s2067_s25, 4  ;;  %s1981_s20 = int_to_ptr.vmem [resolvable:$false] %s1980_s20 }
  0x9c   : > { %p1978_p11 = pnand %p1977_p9, %p2539_p8  ;;  %s1982_s27 = scalar_lea.vmem %s1981_s20, 256 }
  0x9d   : > { %1526 = vmatmul.mubr.msk.bf16.vlgmr.msra.gmra.mxu0 %vm543_vm1, %v522_v5  ;;  %v660_v5 = vrot.slane %v639_v4, %v2353_v8  ;;  %p1983_p13 = scmp.lt.s32.totalorder %s1292_s13, %s1981_s20  ;;  %p1984_p5 = scmp.lt.s32.totalorder %s1982_s27, %s1976_s28 }
  0x9e   : > { %1565 = vmatprep.mubr.msk.bf16.mxu0 %vm2066_vm0, %v2065_v0  ;;  %1534 = vmatpush3.bf16.msra.mxu1 %v1732_v32  ;;  %v1744_v32 = vld [vmem:[#allocation10 + $0x8] sm:$0xff]   ;;  %p1979_p10 = pneg %p1978_p11 }
  0x9f   : > { %1535 = vmatprep.subr.bf16.mxu1 %v2065_v0  ;;  %p1985_p1 = por %p1984_p5, %p1983_p13 }
  0xa1   : > { %p1986_p3 = pnand %p1985_p1, %p1979_p10 }
  0xa2   : > { %1536 = vmatpush3.bf16.msra.mxu1 %v1733_v33  ;;  %v1745_v33 = vld [vmem:[#allocation10] sm:$0xff]  }
  0xa3   : > { %1537 = vmatprep.subr.bf16.mxu1 %v2065_v0 }
  0xa6   : > { %1538 = vmatpush3.bf16.msra.mxu1 %v1734_v34 }
  0xa7   : > { %1539 = vmatprep.subr.bf16.mxu1 %v2065_v0 }
  0xaa   : > { %1540 = vmatpush3.bf16.msra.mxu1 %v1735_v35 }
  0xab   : > { %1541 = vmatprep.subr.bf16.mxu1 %v2065_v0 }
  0xae   : > { %1542 = vmatpush3.bf16.msra.mxu1 %v1736_v36 }
  0xaf   : > { %1543 = vmatprep.subr.bf16.mxu1 %v2065_v0 }
  0xb2   : > { %1544 = vmatpush3.bf16.msra.mxu1 %v1737_v37 }
  0xb3   : > { %1569 = vmatprep.subr.bf16.mxu1 %v2065_v0 }
 0x15d   : > { %v581_v12 = vpop.f32.mrf.mxu0 }
 0x15e   : > { %v582_v13 = vadd.f32 %v581_v12, %v530_v11 }
 0x15f   : > { %v1527_v14 = vpop.f32.mrf.mxu0 }
 0x160   : > { %v591_v15 = vsel %vm590_vm2, %v582_v13, 0.0 }
 0x161   : > { %593 = vadd.xlane.f32.xlu0 %v591_v15  ;;  %v584_v16 = vpop.f32.mrf.mxu0 }
 0x162   : > { %v585_v17 = vadd.f32 %v584_v16, %v530_v11 }
 0x163   : > { %v1528_v18 = vpop.f32.mrf.mxu0 }
 0x164   : > { %v592_v19 = vsel %vm590_vm2, %v585_v17, 0.0 }
 0x165   : > { %595 = vadd.xlane.f32.xlu0 %v592_v19 }
 0x1ea   : > { %v594_v20 = vpop.xlane.xlu0 %593 }
 0x1eb   : > { %v597_v21 = vmul.f32 0.015625, %v594_v20 }
 0x1ed   : > { %v599_v22 = vsub.f32 %v582_v13, %v597_v21 }
 0x1ee   : > { %v596_v23 = vpop.xlane.xlu0 %595 }
 0x1ef   : > { %v598_v24 = vmul.f32 0.015625, %v596_v23  ;;  %v601_v25 = vsel %vm590_vm2, %v599_v22, 0.0 }
 0x1f0   : > { %v603_v26 = vmul.f32 %v601_v25, %v601_v25 }
 0x1f1   : > { %v600_v27 = vsub.f32 %v585_v17, %v598_v24 }
 0x1f2   : > { %605 = vadd.xlane.f32.xlu1 %v603_v26  ;;  %v1738_v26 = vld [vmem:[#allocation10 + $0x38] sm:$0xff]  }
 0x1f3   : > { %v602_v28 = vsel %vm590_vm2, %v600_v27, 0.0  ;;  %1550 = vmatpush3.bf16.msra.mxu0 %v1738_v26  ;;  %v1739_v27 = vld [vmem:[#allocation10 + $0x30] sm:$0xff]   ;;  %v1750_v26 = vld [vmem:[#allocation11 + $0x18] sm:$0xff]  }
 0x1f4   : > { %v604_v29 = vmul.f32 %v602_v28, %v602_v28  ;;  %1551 = vmatprep.subr.bf16.mxu0 %v2065_v0 }
 0x1f6   : > { %607 = vadd.xlane.f32.xlu1 %v604_v29  ;;  %v1741_v29 = vld [vmem:[#allocation10 + $0x20] sm:$0xff]  }
 0x1f7   : > { %1552 = vmatpush3.bf16.msra.mxu0 %v1739_v27  ;;  %v1751_v27 = vld [vmem:[#allocation11 + $0x10] sm:$0xff]  }
 0x1f8   : > { %1553 = vmatprep.subr.bf16.mxu0 %v2065_v0 }
 0x27b   : > { %v606_v38 = vpop.xlane.xlu1 %605 }
 0x27c   : > { %v609_v39 = vmul.f32 0.015625, %v606_v38 }
 0x27e   : > { %v611_v40 = vadd.f32 1e-05, %v609_v39 }
 0x27f   : > { %v608_v41 = vpop.xlane.xlu1 %607 }
 0x280   : > { %1762 = vrsqrt.f32 %v611_v40  ;;  %v610_v42 = vmul.f32 0.015625, %v608_v41  ;;  %v779_v40 = vrot.slane %v639_v4, %v2378_v44 }
 0x282   : > { %v612_v43 = vadd.f32 1e-05, %v610_v42  ;;  %v785_v42 = vrot.slane %v639_v4, %v2380_v45 }
 0x284   : > { %1764 = vrsqrt.f32 %v612_v43 }
 0x28d   : > { %v1763_v47 = vpop.eup %1762 }
 0x28e   : > { %v615_v49 = vmul.f32 %v1763_v47, %v601_v25 }
 0x290   : > { %v621_v50 = vmul.f32 %v620_v46, %v615_v49 }
 0x291   : > { %v1765_v51 = vpop.eup %1764 }
 0x292   : > { %v616_v52 = vmul.f32 %v1765_v51, %v602_v28  ;;  %v627_v53 = vadd.f32 %v626_v48, %v621_v50  ;;  %v1740_v28 = vld [vmem:[#allocation10 + $0x28] sm:$0xff]  }
 0x293   : > { %1554 = vmatpush3.bf16.msra.mxu0 %v1740_v28  ;;  %v1752_v28 = vld [vmem:[#allocation11 + $0x8] sm:$0xff]  }
 0x294   : > { %v622_v54 = vmul.f32 %v620_v46, %v616_v52  ;;  %v631_v55 = vmul.f32 0.70710677, %v627_v53  ;;  %v629_v61 = vmul.f32 0.5, %v627_v53  ;;  %1555 = vmatprep.subr.bf16.mxu0 %v2065_v0 }
 0x296   : > { %v628_v56 = vadd.f32 %v626_v48, %v622_v54  ;;  %1766 = verf.f32 %v631_v55 }
 0x297   : > { %1556 = vmatpush3.bf16.msra.mxu0 %v1741_v29 }
 0x298   : > { %v632_v57 = vmul.f32 0.70710677, %v628_v56  ;;  %v630_v62 = vmul.f32 0.5, %v628_v56  ;;  %1557 = vmatprep.subr.bf16.mxu0 %v2065_v0 }
 0x29a   : > { %1768 = verf.f32 %v632_v57 }
 0x29b   : > { %1558 = vmatpush3.bf16.msra.mxu0 %v1742_v30 }
 0x29c   : > { %1559 = vmatprep.subr.bf16.mxu0 %v2065_v0 }
 0x29f   : > { %1560 = vmatpush3.bf16.msra.mxu0 %v1743_v31 }
 0x2a0   : > { %1561 = vmatprep.subr.bf16.mxu0 %v2065_v0 }
 0x2a3   : > { %v1767_v58 = vpop.eup %1766  ;;  %1562 = vmatpush3.bf16.msra.mxu0 %v1744_v32 }
 0x2a4   : > { %v635_v59 = vadd.f32 1.0, %v1767_v58  ;;  %1563 = vmatprep.subr.bf16.mxu0 %v2065_v0 }
 0x2a6   : > { %v637_v1 = vmul.f32 %v635_v59, %v629_v61 }
 0x2a7   : > { %v1769_v60 = vpop.eup %1768  ;;  %1564 = vmatpush3.bf16.msra.mxu0 %v1745_v33 }
 0x2a8   : > { %v636_v63 = vadd.f32 1.0, %v1769_v60  ;;  %1575 = vmatprep.subr.bf16.mxu0 %v2065_v0 }
 0x2aa   : > { %v638_v2 = vmul.f32 %v636_v63, %v630_v62  ;;  %v798_v63 = vld [vmem:[%s2501_s7] sm:$0x7] }
 0x2ac   : > { %v640_v3 = vpack.c.bf16 %v638_v2, %v637_v1  ;;  %v819_v1 = vrot.slane %v798_v63, %v2353_v8 }
 0x2ae   : > { %1546 = vmatmul.mubr.bf16.vlgmr.msra.gmra.mxu1 %v640_v3 }
 0x2af   : > { %1571 = vmatprep.mubr.msk.bf16.mxu1 %vm2066_vm0, %v2065_v0 }
 0x36e   : > { %v743_v6 = vpop.f32.mrf.mxu1 }
 0x36f   : > { %v744_v7 = vadd.f32 %v743_v6, %v660_v5 }
 0x370   : > { %v1547_v9 = vpop.f32.mrf.mxu1 }
 0x371   : > { %v750_v11 = vsel %vm590_vm2, %v744_v7, 0.0 }
 0x372   : > { %752 = vadd.xlane.f32.xlu0 %v750_v11  ;;  %v746_v12 = vpop.f32.mrf.mxu1 }
 0x373   : > { %v747_v13 = vadd.f32 %v746_v12, %v660_v5 }
 0x374   : > { %v1548_v14 = vpop.f32.mrf.mxu1 }
 0x375   : > { %v751_v15 = vsel %vm590_vm2, %v747_v13, 0.0 }
 0x376   : > { %754 = vadd.xlane.f32.xlu1 %v751_v15 }
 0x3fb   : > { %v753_v16 = vpop.xlane.xlu0 %752 }
 0x3fc   : > { %v756_v17 = vmul.f32 0.015625, %v753_v16 }
 0x3fe   : > { %v758_v18 = vsub.f32 %v744_v7, %v756_v17 }
 0x3ff   : > { %v755_v19 = vpop.xlane.xlu1 %754 }
 0x400   : > { %v757_v20 = vmul.f32 0.015625, %v755_v19  ;;  %v760_v21 = vsel %vm590_vm2, %v758_v18, 0.0 }
 0x401   : > { %v762_v22 = vmul.f32 %v760_v21, %v760_v21 }
 0x402   : > { %v759_v23 = vsub.f32 %v747_v13, %v757_v20 }
 0x403   : > { %764 = vadd.xlane.f32.xlu0 %v762_v22  ;;  %v1746_v22 = vld [vmem:[#allocation11 + $0x38] sm:$0xff]  }
 0x404   : > { %v761_v24 = vsel %vm590_vm2, %v759_v23, 0.0  ;;  %v1747_v23 = vld [vmem:[#allocation11 + $0x30] sm:$0xff]  }
 0x405   : > { %v763_v25 = vmul.f32 %v761_v24, %v761_v24 }
 0x407   : > { %766 = vadd.xlane.f32.xlu1 %v763_v25  ;;  %v1749_v25 = vld [vmem:[#allocation11 + $0x20] sm:$0xff]  }
 0x48c   : > { %v765_v34 = vpop.xlane.xlu0 %764 }
 0x48d   : > { %v768_v35 = vmul.f32 0.015625, %v765_v34 }
 0x48f   : > { %v770_v36 = vadd.f32 1e-05, %v768_v35  ;;  %v938_v35 = vrot.slane %v798_v63, %v2378_v44 }
 0x490   : > { %v767_v37 = vpop.xlane.xlu1 %766 }
 0x491   : > { %1770 = vrsqrt.f32 %v770_v36  ;;  %v769_v38 = vmul.f32 0.015625, %v767_v37  ;;  %v944_v37 = vrot.slane %v798_v63, %v2380_v45 }
 0x493   : > { %v771_v39 = vadd.f32 1e-05, %v769_v38 }
 0x495   : > { %1772 = vrsqrt.f32 %v771_v39 }
 0x49e   : > { %v1771_v41 = vpop.eup %1770 }
 0x49f   : > { %v774_v43 = vmul.f32 %v1771_v41, %v760_v21 }
 0x4a1   : > { %v780_v46 = vmul.f32 %v779_v40, %v774_v43 }
 0x4a2   : > { %v1773_v47 = vpop.eup %1772 }
 0x4a3   : > { %v775_v48 = vmul.f32 %v1773_v47, %v761_v24  ;;  %v786_v49 = vadd.f32 %v785_v42, %v780_v46  ;;  %v1748_v24 = vld [vmem:[#allocation11 + $0x28] sm:$0xff]  }
 0x4a5   : > { %v781_v50 = vmul.f32 %v779_v40, %v775_v48  ;;  %v790_v51 = vmul.f32 0.70710677, %v786_v49  ;;  %v788_v57 = vmul.f32 0.5, %v786_v49 }
 0x4a7   : > { %v787_v52 = vadd.f32 %v785_v42, %v781_v50  ;;  %1774 = verf.f32 %v790_v51 }
 0x4a9   : > { %v791_v53 = vmul.f32 0.70710677, %v787_v52  ;;  %v789_v58 = vmul.f32 0.5, %v787_v52 }
 0x4ab   : > { %1776 = verf.f32 %v791_v53 }
 0x4b4   : > { %v1775_v54 = vpop.eup %1774 }
 0x4b5   : > { %v794_v55 = vadd.f32 1.0, %v1775_v54 }
 0x4b7   : > { %v796_v60 = vmul.f32 %v794_v55, %v788_v57 }
 0x4b8   : > { %v1777_v56 = vpop.eup %1776 }
 0x4b9   : > { %v795_v59 = vadd.f32 1.0, %v1777_v56 }
 0x4bb   : > { %v797_v61 = vmul.f32 %v795_v59, %v789_v58  ;;  %v957_v58 = vld [vmem:[#allocation5] sm:$0xf]  ;;  %v1753_v59 = vld [vmem:[#allocation11] sm:$0xff]  }
 0x4bd   : > { %v799_v62 = vpack.c.bf16 %v797_v61, %v796_v60 }
 0x4bf   : > { %1566 = vmatmul.mubr.bf16.vlgmr.msra.gmra.mxu0 %v799_v62 }
 0x4c0   : > { %1591 = vmatprep.mubr.msk.bf16.mxu0 %vm2066_vm0, %v2065_v0  ;;  %1576 = vmatpush3.bf16.msra.mxu0 %v1746_v22  ;;  %v1758_v22 = vld [vmem:[#allocation13 + $0x18] sm:$0xff]  }
 0x4c1   : > { %1577 = vmatprep.subr.bf16.mxu0 %v2065_v0 }
 0x4c4   : > { %1578 = vmatpush3.bf16.msra.mxu0 %v1747_v23  ;;  %v1759_v23 = vld [vmem:[#allocation13 + $0x10] sm:$0xff]  }
 0x4c5   : > { %1579 = vmatprep.subr.bf16.mxu0 %v2065_v0 }
 0x4c8   : > { %1580 = vmatpush3.bf16.msra.mxu0 %v1748_v24  ;;  %v1760_v24 = vld [vmem:[#allocation13 + $0x8] sm:$0xff]  }
 0x4c9   : > { %1581 = vmatprep.subr.bf16.mxu0 %v2065_v0 }
 0x4cc   : > { %1582 = vmatpush3.bf16.msra.mxu0 %v1749_v25  ;;  %v1761_v25 = vld [vmem:[#allocation13] sm:$0xff]  }
 0x4cd   : > { %1583 = vmatprep.subr.bf16.mxu0 %v2065_v0 }
 0x4d0   : > { %1584 = vmatpush3.bf16.msra.mxu0 %v1750_v26 }
 0x4d1   : > { %1585 = vmatprep.subr.bf16.mxu0 %v2065_v0 }
 0x4d4   : > { %1586 = vmatpush3.bf16.msra.mxu0 %v1751_v27 }
 0x4d5   : > { %1587 = vmatprep.subr.bf16.mxu0 %v2065_v0 }
 0x4d8   : > { %1588 = vmatpush3.bf16.msra.mxu0 %v1752_v28 }
 0x4d9   : > { %1589 = vmatprep.subr.bf16.mxu0 %v2065_v0 }
 0x4dc   : > { %1590 = vmatpush3.bf16.msra.mxu0 %v1753_v59 }
 0x57f   : > { %v902_v2 = vpop.f32.mrf.mxu0 }
 0x580   : > { %v903_v3 = vadd.f32 %v902_v2, %v819_v1 }
 0x581   : > { %v1567_v4 = vpop.f32.mrf.mxu0 }
 0x582   : > { %v909_v5 = vsel %vm590_vm2, %v903_v3, 0.0 }
 0x583   : > { %911 = vadd.xlane.f32.xlu0 %v909_v5  ;;  %v905_v6 = vpop.f32.mrf.mxu0 }
 0x584   : > { %v906_v7 = vadd.f32 %v905_v6, %v819_v1 }
 0x585   : > { %v1568_v9 = vpop.f32.mrf.mxu0 }
 0x586   : > { %v910_v11 = vsel %vm590_vm2, %v906_v7, 0.0 }
 0x587   : > { %913 = vadd.xlane.f32.xlu1 %v910_v11 }
 0x60c   : > { %v912_v12 = vpop.xlane.xlu0 %911 }
 0x60d   : > { %v915_v13 = vmul.f32 0.015625, %v912_v12 }
 0x60f   : > { %v917_v14 = vsub.f32 %v903_v3, %v915_v13  ;;  %v1004_v3 = vld [vmem:[%s2503_s9] sm:$0x7] }
 0x610   : > { %v914_v15 = vpop.xlane.xlu1 %913  ;;  %v1025_v4 = vrot.slane %v1004_v3, %v2353_v8 }
 0x611   : > { %v916_v16 = vmul.f32 0.015625, %v914_v15  ;;  %v919_v17 = vsel %vm590_vm2, %v917_v14, 0.0 }
 0x612   : > { %v921_v18 = vmul.f32 %v919_v17, %v919_v17 }
 0x613   : > { %v918_v19 = vsub.f32 %v906_v7, %v916_v16 }
 0x614   : > { %923 = vadd.xlane.f32.xlu0 %v921_v18  ;;  %v1754_v18 = vld [vmem:[#allocation13 + $0x38] sm:$0xff]  }
 0x615   : > { %v920_v20 = vsel %vm590_vm2, %v918_v19, 0.0  ;;  %v1755_v19 = vld [vmem:[#allocation13 + $0x30] sm:$0xff]  }
 0x616   : > { %v922_v21 = vmul.f32 %v920_v20, %v920_v20 }
 0x618   : > { %925 = vadd.xlane.f32.xlu1 %v922_v21  ;;  %v1757_v21 = vld [vmem:[#allocation13 + $0x20] sm:$0xff]  }
 0x69d   : > { %v924_v29 = vpop.xlane.xlu0 %923 }
 0x69e   : > { %v927_v30 = vmul.f32 0.015625, %v924_v29  ;;  %v1131_v29 = vrot.slane %v1004_v3, %v2378_v44 }
 0x6a0   : > { %v929_v31 = vadd.f32 1e-05, %v927_v30 }
 0x6a1   : > { %v926_v32 = vpop.xlane.xlu1 %925 }
 0x6a2   : > { %1778 = vrsqrt.f32 %v929_v31  ;;  %v928_v33 = vmul.f32 0.015625, %v926_v32  ;;  %v1136_v31 = vrot.slane %v1004_v3, %v2380_v45 }
 0x6a4   : > { %v930_v34 = vadd.f32 1e-05, %v928_v33 }
 0x6a6   : > { %1780 = vrsqrt.f32 %v930_v34 }
 0x6af   : > { %v1779_v36 = vpop.eup %1778 }
 0x6b0   : > { %v933_v38 = vmul.f32 %v1779_v36, %v919_v17 }
 0x6b2   : > { %v939_v39 = vmul.f32 %v938_v35, %v933_v38 }
 0x6b3   : > { %v1781_v40 = vpop.eup %1780 }
 0x6b4   : > { %v934_v41 = vmul.f32 %v1781_v40, %v920_v20  ;;  %v945_v42 = vadd.f32 %v944_v37, %v939_v39  ;;  %v1756_v20 = vld [vmem:[#allocation13 + $0x28] sm:$0xff]  }
 0x6b5   : > { %v1143_v40 = vld [vmem:[%s2505_s11] sm:$0x7] }
 0x6b6   : > { %v940_v43 = vmul.f32 %v938_v35, %v934_v41  ;;  %v949_v46 = vmul.f32 0.70710677, %v945_v42  ;;  %v947_v52 = vmul.f32 0.5, %v945_v42  ;;  %v1164_v41 = vrot.slane %v1143_v40, %v2353_v8 }
 0x6b7   : > { %v1274_v59 = vrot.slane %v1143_v40, %v2380_v45 }
 0x6b8   : > { %v946_v47 = vadd.f32 %v944_v37, %v940_v43  ;;  %1782 = verf.f32 %v949_v46 }
 0x6ba   : > { %v950_v48 = vmul.f32 0.70710677, %v946_v47  ;;  %v948_v53 = vmul.f32 0.5, %v946_v47 }
 0x6bc   : > { %1784 = verf.f32 %v950_v48 }
 0x6c5   : > { %v1783_v49 = vpop.eup %1782 }
 0x6c6   : > { %v953_v50 = vadd.f32 1.0, %v1783_v49 }
 0x6c8   : > { %v955_v55 = vmul.f32 %v953_v50, %v947_v52 }
 0x6c9   : > { %v1785_v51 = vpop.eup %1784 }
 0x6ca   : > { %v954_v54 = vadd.f32 1.0, %v1785_v51 }
 0x6cc   : > { %v956_v56 = vmul.f32 %v954_v54, %v948_v53 }
 0x6ce   : > { %v958_v57 = vpack.c.bf16 %v956_v56, %v955_v55 }
 0x6d0   : > { %1570 = vmatpush3.bf16.msra.mxu1 %v958_v57  ;;  %v1269_v57 = vrot.slane %v1143_v40, %v2378_v44 }
 0x6d1   : > { %1595 = vmatprep.subr.bf16.mxu1 %v2065_v0 }
 0x6d3   : > { %1572 = vmatmul.mubr.msk.bf16.vlgmr.msra.gmra.mxu1 %vm959_vm3, %v957_v58 }
 0x6d4   : > { %1611 = vmatprep.mubr.msk.bf16.mxu1 %vm2066_vm0, %v2065_v0  ;;  %1596 = vmatpush3.bf16.msra.mxu1 %v1754_v18 }
 0x6d5   : > { %1597 = vmatprep.subr.bf16.mxu1 %v2065_v0 }
 0x6d8   : > { %1598 = vmatpush3.bf16.msra.mxu1 %v1755_v19 }
 0x6d9   : > { %1599 = vmatprep.subr.bf16.mxu1 %v2065_v0 }
 0x6dc   : > { %1600 = vmatpush3.bf16.msra.mxu1 %v1756_v20 }
 0x6dd   : > { %1601 = vmatprep.subr.bf16.mxu1 %v2065_v0 }
 0x6e0   : > { %1602 = vmatpush3.bf16.msra.mxu1 %v1757_v21 }
 0x6e1   : > { %1603 = vmatprep.subr.bf16.mxu1 %v2065_v0 }
 0x6e4   : > { %1604 = vmatpush3.bf16.msra.mxu1 %v1758_v22 }
 0x6e5   : > { %1605 = vmatprep.subr.bf16.mxu1 %v2065_v0 }
 0x6e8   : > { %1606 = vmatpush3.bf16.msra.mxu1 %v1759_v23 }
 0x6e9   : > { %1607 = vmatprep.subr.bf16.mxu1 %v2065_v0 }
 0x6ec   : > { %1608 = vmatpush3.bf16.msra.mxu1 %v1760_v24 }
 0x6ed   : > { %1609 = vmatprep.subr.bf16.mxu1 %v2065_v0 }
 0x6f0   : > { %1610 = vmatpush3.bf16.msra.mxu1 %v1761_v25 }
 0x793   : > { %v997_v60 = vpop.f32.mrf.mxu1 }
 0x794   : > { %v1003_v61 = vmul.f32 0.5, %v997_v60 }
 0x795   : > { %v1573_v62 = vpop.f32.mrf.mxu1 }
 0x796   : > { %v1005_v63 = vpack.c.bf16 %v1003_v61, %v1003_v61 }
 0x797   : > { %v1000_v1 = vpop.f32.mrf.mxu1 }
 0x798   : > { %1592 = vmatmul.mubr.bf16.vlgmr.msra.gmra.mxu0 %v1005_v63 }
 0x799   : > { %v1574_v2 = vpop.f32.mrf.mxu1 }
 0x858   : > { %v1108_v5 = vpop.f32.mrf.mxu0 }
 0x859   : > { %v1109_v6 = vadd.f32 %v1108_v5, %v1025_v4 }
 0x85a   : > { %v1593_v7 = vpop.f32.mrf.mxu0 }
 0x85b   : > { %v1115_v9 = vsel %vm1114_vm4, %v1109_v6, 0.0 }
 0x85c   : > { %1116 = vadd.xlane.f32.xlu0 %v1115_v9  ;;  %v1111_v11 = vpop.f32.mrf.mxu0 }
 0x85e   : > { %v1594_v12 = vpop.f32.mrf.mxu0 }
 0x8e5   : > { %v1117_v13 = vpop.xlane.xlu0 %1116 }
 0x8e6   : > { %v1118_v14 = vmul.f32 0.03125, %v1117_v13 }
 0x8e8   : > { %v1119_v15 = vsub.f32 %v1109_v6, %v1118_v14 }
 0x8ea   : > { %v1120_v16 = vsel %vm1114_vm4, %v1119_v15, 0.0 }
 0x8eb   : > { %v1121_v17 = vmul.f32 %v1120_v16, %v1120_v16 }
 0x8ed   : > { %1122 = vadd.xlane.f32.xlu1 %v1121_v17 }
 0x976   : > { %v1123_v26 = vpop.xlane.xlu1 %1122 }
 0x977   : > { %v1124_v27 = vmul.f32 0.03125, %v1123_v26 }
 0x979   : > { %v1125_v28 = vadd.f32 1e-05, %v1124_v27 }
 0x97b   : > { %1786 = vrsqrt.f32 %v1125_v28 }
 0x988   : > { %v1787_v30 = vpop.eup %1786 }
 0x989   : > { %v1127_v32 = vmul.f32 %v1787_v30, %v1120_v16 }
 0x98b   : > { %v1132_v33 = vmul.f32 %v1131_v29, %v1127_v32 }
 0x98d   : > { %v1137_v34 = vadd.f32 %v1136_v31, %v1132_v33 }
 0x98f   : > { %v1139_v35 = vmul.f32 0.70710677, %v1137_v34  ;;  %v1138_v37 = vmul.f32 0.5, %v1137_v34 }
 0x991   : > { %1788 = verf.f32 %v1139_v35 }
 0x99e   : > { %v1789_v36 = vpop.eup %1788 }
 0x99f   : > { %v1141_v38 = vadd.f32 1.0, %v1789_v36 }
 0x9a1   : > { %v1142_v39 = vmul.f32 %v1141_v38, %v1138_v37 }
 0x9a3   : > { %v1144_v0 = vpack.c.bf16 %v1142_v39, %v1142_v39 }
 0x9a5   : > { %1612 = vmatmul.mubr.bf16.vlgmr.msra.gmra.mxu1 %v1144_v0 }
 0xa65   : > { %v1247_v42 = vpop.f32.mrf.mxu1 }
 0xa66   : > { %v1248_v43 = vadd.f32 %v1247_v42, %v1164_v41 }
 0xa67   : > { %v1613_v46 = vpop.f32.mrf.mxu1 }
 0xa68   : > { %v1253_v47 = vsel %vm590_vm2, %v1248_v43, 0.0 }
 0xa69   : > { %1254 = vadd.xlane.f32.xlu0 %v1253_v47  ;;  %v1250_v48 = vpop.f32.mrf.mxu1 }
 0xa6b   : > { %v1614_v49 = vpop.f32.mrf.mxu1 }
 0xaf2   : > { %v1255_v50 = vpop.xlane.xlu0 %1254 }
 0xaf3   : > { %v1256_v51 = vmul.f32 0.015625, %v1255_v50 }
 0xaf5   : > { %v1257_v52 = vsub.f32 %v1248_v43, %v1256_v51 }
 0xaf7   : > { %v1258_v53 = vsel %vm590_vm2, %v1257_v52, 0.0 }
 0xaf8   : > { %v1259_v54 = vmul.f32 %v1258_v53, %v1258_v53 }
 0xafa   : > { %1260 = vadd.xlane.f32.xlu1 %v1259_v54 }
 0xb83   : > { %v1261_v8 = vpop.xlane.xlu1 %1260 }
 0xb84   : > { %v1262_v55 = vmul.f32 0.015625, %v1261_v8 }
 0xb86   : > { %v1263_v56 = vadd.f32 1e-05, %v1262_v55 }
 0xb88   : > { %1790 = vrsqrt.f32 %v1263_v56 }
 0xb95   : > { %v1791_v58 = vpop.eup %1790 }
 0xb96   : > { %v1265_v60 = vmul.f32 %v1791_v58, %v1258_v53 }
 0xb98   : > { %v1270_v10 = vmul.f32 %v1269_v57, %v1265_v60 }
 0xb9a   : > { %v1275_v61 = vadd.f32 %v1274_v59, %v1270_v10 }
 0xb9c   : > { %1276 = vst [vmem:[%s516_s30] sm:$0xff] %v1275_v61 }
 0xb9d   : > { %1989 = shalt.err (!%p1986_p3)
}
 0xb9e   : > { %s1990_s29 = scalar_lea.hbm %s1289_s4, 128  ;;  %s1994_s8 = scalar_lea.hbm %s2506_s12, 256 }
 0xb9f   : > { %p1991_p4 = scmp.ne.s32.totalorder %s1289_s4, %s1990_s29  ;;  %p1995_p0 = scmp.lt.s32.totalorder %s1289_s4, %s2506_s12 }
 0xba0   : > { %p1996_p7 = scmp.lt.s32.totalorder %s1994_s8, %s1990_s29 }
 0xba1   : > { %p1992_p6 = pnand %p1991_p4, %p2539_p8 }
 0xba2   : > { %p1997_p2 = por %p1996_p7, %p1995_p0 }
 0xba3   : > { %p1993_p12 = pneg %p1992_p6 }
 0xba5   : > { %p1998_p9 = pnand %p1997_p2, %p1993_p12 }
 0xba7   : > { %2001 = shalt.err (!%p1998_p9)
}
 0xba8   : > { %1641 = dma.vmem_to_hbm [thread:$0]  (%p2539_p8), %s1292_s13, 128, %s1289_s4, %s1278_s6  }
 0xba9 PF: > { %s1303_s30 = sand.u32 1, %s2040_s21   ;;  %p2540_p11 = scmp.ne.s32.totalorder %s2529_s15, 0 }
 0xbaa   : > { %p2541_p10 = scmp.ge.s32.totalorder %s2052_s24, 2  ;;  %s1304_s1 = scalar_lea.sflag [#allocation4], %s1303_s30 }
 0xbac   : > { %p1667_p13 = pnand %p2541_p10, %p2540_p11 }
 0xbae   : > { %p1668_p5 = pneg %p1667_p13 }
 0xbb0   : > { %2035 = dma.done.wait (%p1668_p5), %s1304_s1, 128  }
 0xbb1   : > { %2037 = vsyncadd (%p1668_p5), %s1304_s1, 4294967168  ;;  %p28_p1 = scmp.ge.s32.totalorder %s2251_s16, 4   ;;  %s2542_s21 = smov %s2044_s22 }
 0xbb2   : > { %s2543_s22 = smov %s2048_s23  ;;  %s2544_s23 = smov %s2262_s26 }
 0xbb3   : > { %s2545_s24 = smov %s2251_s16  ;;  %30 = sbr.rel (!%p28_p1) target bundleno = 15 (0xf), region = 137 }
 0xbb8   :  { %1309 = vsyncpa [#allocation3], 1 }
 0xbb9   :  { %1311 = vsyncpa [#allocation3 + $0x1], 1 }
 0xbba   :  { %1312 = vsyncpa [#allocation6], 1 }
 0xbbb   :  { %1313 = vsyncpa [#allocation9], 1 }
 0xbbc   :  { %1314 = vsyncpa [#allocation12], 1 }
 0xbbd   :  { %1315 = vsyncpa [#allocation4], 1 }
 0xbbe   :  { %1317 = vsyncpa [#allocation4 + $0x1], 1 }

</bundles_post_ra>
